<compile_context>
chip_gen: v7x
topology: tpu7x:2x2x1
jax: 0.10.0
libtpu: 0.0.40
codegen_flags: <defaults>
</compile_context>

<pallas_src>
import functools

import jax
import jax.numpy as jnp
from jax.experimental import pallas as pl
from jax.experimental.pallas import tpu as pltpu


_VMEM_LIMIT = 48 * 1024 * 1024  # > scoped default everywhere, < v7x 64 MiB physical


# ---------------------------------------------------------------------------
# tile pickers (all return divisors of the axis, honoring the (8,128) rule)
# ---------------------------------------------------------------------------
def _pick_lane_tile(total, target):
    """Largest multiple of 128 dividing `total` and <= target, else the full axis."""
    if total <= target:
        return total
    t = (target // 128) * 128
    while t >= 128:
        if total % t == 0:
            return t
        t -= 128
    return total


def _pick_sublane_tile(total, target):
    """Largest multiple of 8 dividing `total` and <= target, else the full axis."""
    if total <= target:
        return total
    t = (target // 8) * 8
    while t >= 8:
        if total % t == 0:
            return t
        t -= 8
    return total


def _pick_divisor(total, target):
    t = min(total, target)
    while total % t:
        t -= 1
    return t


# ---------------------------------------------------------------------------
# Kernel 1: streamed spatial mean over H*W (lane axis), native layout
# ---------------------------------------------------------------------------
def _spatial_mean_kernel(x_ref, mean_ref, acc_ref, *, inv_n):
    # x_ref: (1, tc, D, tn) f32 (tn = H*W tile on lanes).  acc_ref: (tc, D) f32.
    n = pl.program_id(2)

    @pl.when(n == 0)
    def _():
        acc_ref[...] = jnp.zeros_like(acc_ref)

    acc_ref[...] += jnp.sum(x_ref[0], axis=-1)          # lane-dense streaming reduce

    @pl.when(n == pl.num_programs(2) - 1)
    def _():
        mean_ref[0] = (acc_ref[...] * inv_n).astype(mean_ref.dtype)


# ---------------------------------------------------------------------------
# Kernel 2: spectral mix q[b, c] = attn[b] (D,D) @ x[b, c] (D, tn), H*W on lanes
# ---------------------------------------------------------------------------
def _spectral_mix_kernel(attn_ref, x_ref, q_ref):
    # attn_ref: (1, D, nb) f32 (rows softmaxed).  x_ref/q_ref: (1, tc, D, tn).
    a = attn_ref[0]
    for i in range(x_ref.shape[1]):                     # small static channel sub-tile
        q_ref[0, i] = jnp.dot(a, x_ref[0, i],
                              preferred_element_type=jnp.float32).astype(q_ref.dtype)


# ---------------------------------------------------------------------------
# Kernel 3: fused (value_proj∘fc) chain + residual + SM-FFN,
#           channels on sublanes / flattened D*H*W on lanes (lane-dense stores)
# ---------------------------------------------------------------------------
def _chain_ffn_kernel(q_ref, x_ref, wc_ref, w1_ref, w2_ref, w3a_ref, w3b_ref, o_ref):
    q = q_ref[0].astype(jnp.float32)                    # (C, tsp), bf16 -> f32
    # GSSA channel chain fc(value_proj(.)) pre-fused into wc = wf @ wv, plus residual.
    r = jnp.dot(wc_ref[...], q, preferred_element_type=jnp.float32) + x_ref[0]
    # SM-FFN: w2 @ gelu(w1 @ r) + (w3a @ r) * sigmoid(w3b @ r)
    h1 = jnp.dot(w1_ref[...], r, preferred_element_type=jnp.float32)
    g1 = 0.5 * h1 * (1.0 + jnp.tanh(0.7978845608028654 *
                                    (h1 + 0.044715 * h1 * h1 * h1)))
    x1 = jnp.dot(w2_ref[...], g1, preferred_element_type=jnp.float32)
    a = jnp.dot(w3a_ref[...], r, preferred_element_type=jnp.float32)
    g = jnp.dot(w3b_ref[...], r, preferred_element_type=jnp.float32)
    o_ref[0] = (x1 + a * jax.nn.sigmoid(g)).astype(o_ref.dtype)


# ---------------------------------------------------------------------------
# Wrapper (no activation-tensor transposes: only free reshapes of trailing dims)
# ---------------------------------------------------------------------------
def transformer_block_forward(x, params, *, q_dtype=jnp.bfloat16,
                              tc_mean=None, tn_mean=None,
                              tc_mix=None, tn_mix=None, tsp_ffn=None):
    """x: (B, C, D, H, W) f32.  params: dict with wa, ba, wv, wf, w1, w2, w3."""
    wa, ba = params["wa"], params["ba"]
    wv, wf = params["wv"], params["wf"]
    w1, w2, w3 = params["w1"], params["w2"], params["w3"]

    B, C, D, H, W = x.shape
    nb = wa.shape[0]
    assert D == nb, "GSSA requires D == num_bands (attn reshape)"
    N = H * W
    DN = D * N
    f32 = jnp.float32

    # Tile sizes: divisors of their axes, targeting ~1-2 MiB double-buffered blocks.
    tn_mean = tn_mean or _pick_lane_tile(N, 1024)
    tc_mean = tc_mean or _pick_sublane_tile(C, 32)
    tn_mix = tn_mix or _pick_lane_tile(N, 1024)
    tc_mix = tc_mix or _pick_divisor(C, 8)
    tsp_ffn = tsp_ffn or _pick_lane_tile(DN, 2048)
    assert N % tn_mean == 0 and C % tc_mean == 0
    assert N % tn_mix == 0 and C % tc_mix == 0
    assert DN % tsp_ffn == 0

    def cparams(sem):
        return pltpu.CompilerParams(dimension_semantics=sem,
                                    vmem_limit_bytes=_VMEM_LIMIT)

    # Free views of x (no data movement): (B,C,D,H,W) -> (B,C,D,N) -> (B,C,D*N).
    x_cdn = x.reshape(B, C, D, N)
    x_flat = x_cdn.reshape(B, C, DN)

    # ---- kernel 1: streamed spatial mean -> (B, C, D) ----
    mean_bcd = pl.pallas_call(
        functools.partial(_spatial_mean_kernel, inv_n=1.0 / N),
        out_shape=jax.ShapeDtypeStruct((B, C, D), f32),
        grid=(B, C // tc_mean, N // tn_mean),
        in_specs=[pl.BlockSpec((1, tc_mean, D, tn_mean),
                               lambda b, c, n: (b, c, 0, n))],
        out_specs=pl.BlockSpec((1, tc_mean, D), lambda b, c, n: (b, c, 0)),
        scratch_shapes=[pltpu.VMEM((tc_mean, D), f32)],
        compiler_params=cparams(("parallel", "parallel", "arbitrary")),
    )(x_cdn)

    # KB-sized attn-proj + softmax finish: plain XLA (negligible vs. the big passes).
    logits = jnp.einsum("bcd,jc->bdj", mean_bcd, wa) + ba     # (B, D, nb)
    attn = jax.nn.softmax(logits, axis=-1)

    # ---- kernel 2: spectral mix, q emitted in bfloat16 ----
    q_cdn = pl.pallas_call(
        _spectral_mix_kernel,
        out_shape=jax.ShapeDtypeStruct((B, C, D, N), q_dtype),
        grid=(B, C // tc_mix, N // tn_mix),
        in_specs=[
            pl.BlockSpec((1, D, nb), lambda b, c, n: (b, 0, 0)),
            pl.BlockSpec((1, tc_mix, D, tn_mix), lambda b, c, n: (b, c, 0, n)),
        ],
        out_specs=pl.BlockSpec((1, tc_mix, D, tn_mix), lambda b, c, n: (b, c, 0, n)),
        compiler_params=cparams(("parallel", "parallel", "parallel")),
    )(attn, x_cdn)

    # ---- kernel 3: fused channel chain + residual + SM-FFN ----
    wc = wf @ wv                       # fc(value_proj(.)) pre-fused, left-multiply form
    w3a, w3b = w3[:C], w3[C:]          # chunk of w_3 outputs: value / gate
    q_flat = q_cdn.reshape(B, C, DN)   # free reshape (same HBM bytes)
    out_flat = pl.pallas_call(
        _chain_ffn_kernel,
        out_shape=jax.ShapeDtypeStruct((B, C, DN), x.dtype),
        grid=(B, DN // tsp_ffn),
        in_specs=[
            pl.BlockSpec((1, C, tsp_ffn), lambda b, s: (b, 0, s)),
            pl.BlockSpec((1, C, tsp_ffn), lambda b, s: (b, 0, s)),
            pl.BlockSpec((C, C), lambda b, s: (0, 0)),
            pl.BlockSpec((2 * C, C), lambda b, s: (0, 0)),
            pl.BlockSpec((C, 2 * C), lambda b, s: (0, 0)),
            pl.BlockSpec((C, C), lambda b, s: (0, 0)),
            pl.BlockSpec((C, C), lambda b, s: (0, 0)),
        ],
        out_specs=pl.BlockSpec((1, C, tsp_ffn), lambda b, s: (b, 0, s)),
        compiler_params=cparams(("parallel", "parallel")),
    )(q_flat, x_flat, wc, w1, w2, w3a, w3b)

    return out_flat.reshape(B, C, D, H, W)


# ---------------------------------------------------------------------------
# Pure-JAX reference (mirrors the PyTorch eval-mode forward of TransformerBlock)
# ---------------------------------------------------------------------------
def _gelu_tanh(v):
    return 0.5 * v * (1.0 + jnp.tanh(0.7978845608028654 * (v + 0.044715 * v ** 3)))


def transformer_block_ref(x, params):
    wa, ba = params["wa"], params["ba"]
    wv, wf = params["wv"], params["wf"]
    w1, w2, w3 = params["w1"], params["w2"], params["w3"]
    B, C, D, H, W = x.shape

    # GSSA (eval path, flex=False)
    tmp = jnp.transpose(x.reshape(B, C, D, H * W).mean(-1), (0, 2, 1))   # (B, D, C)
    attn = jax.nn.softmax(tmp @ wa.T + ba, axis=-1)                      # (B, D, nb)
    attn5 = attn[:, None, None, :, :]
    xr = jnp.transpose(x, (0, 3, 4, 2, 1))                               # b h w d c
    v = xr @ wv.T
    q = jnp.matmul(attn5, v)
    q = q @ wf.T
    q = jnp.transpose(q, (0, 4, 3, 1, 2)) + x                            # b c d h w

    # SM-FFN
    r = jnp.transpose(q, (0, 2, 3, 4, 1))                                # b d h w c
    h1 = _gelu_tanh(r @ w1.T)
    x1 = h1 @ w2.T
    h3 = r @ w3.T
    a, g = h3[..., :C], h3[..., C:]
    out = x1 + a * jax.nn.sigmoid(g)
    return jnp.transpose(out, (0, 4, 1, 2, 3))                           # b c d h w


if __name__ == "__main__":
    B, C, D, H, W = 2, 16, 8, 8, 8      # channels=16, num_bands == D == 8
    nb = D

    key = jax.random.PRNGKey(0)
    ks = jax.random.split(key, 8)
    x = jax.random.normal(ks[0], (B, C, D, H, W), dtype=jnp.float32)
    params = dict(
        wa=0.1 * jax.random.normal(ks[1], (nb, C), jnp.float32),      # attn_proj.weight
        ba=0.1 * jax.random.normal(ks[2], (nb,), jnp.float32),        # attn_proj.bias
        wv=0.1 * jax.random.normal(ks[3], (C, C), jnp.float32),       # value_proj.weight
        wf=0.1 * jax.random.normal(ks[4], (C, C), jnp.float32),       # fc.weight
        w1=0.1 * jax.random.normal(ks[5], (2 * C, C), jnp.float32),   # ffn.w_1.weight
        w2=0.1 * jax.random.normal(ks[6], (C, 2 * C), jnp.float32),   # ffn.w_2.weight
        w3=0.1 * jax.random.normal(ks[7], (2 * C, C), jnp.float32),   # ffn.w_3.weight
    )

    out = jax.jit(transformer_block_forward)(x, params)
    out = jax.block_until_ready(out)

    out_ref = transformer_block_ref(x, params)
    assert out.shape == (B, C, D, H, W)
    err = float(jnp.max(jnp.abs(out - out_ref)))
    # q intermediate is stored in bf16 (perf review), so allow a few e-3 of slack.
    assert err < 5e-3, f"mismatch, max abs err {err}"

    print("KERNEL_OK")
</pallas_src>

<mosaic_0001>
module attributes {stable_mosaic.version = 11 : i64} {
  func.func @_spatial_mean_kernel(%arg0: i32, %arg1: i32, %arg2: i32, %arg3: memref<1x16x8x64xf32, #tpu.memory_space<vmem>>, %arg4: memref<1x16x8xf32, #tpu.memory_space<vmem>>, %arg5: memref<16x8xf32, #tpu.memory_space<vmem>>) attributes {dimension_semantics = [#tpu.dimension_semantics<parallel>, #tpu.dimension_semantics<parallel>, #tpu.dimension_semantics<arbitrary>], iteration_bounds = array<i64: 2, 1, 1>, scalar_prefetch = 0 : i64, scratch_operands = 1 : i64, tpu.core_type = #tpu.core_type<tc>, window_params = [{transform_indices = @transform_0, window_bounds = array<i64: 1, 16, 8, 64>}, {transform_indices = @transform_1, window_bounds = array<i64: 1, 16, 8>}]} {
    %c0_i32 = arith.constant 0 : i32
    %0 = arith.cmpi eq, %arg2, %c0_i32 : i32
    %1 = arith.extui %0 : i1 to i32
    %c0_i32_0 = arith.constant 0 : i32
    %2 = arith.cmpi ne, %1, %c0_i32_0 : i32
    scf.if %2 {
      %cst_10 = arith.constant 0.000000e+00 : f32
      %12 = vector.broadcast %cst_10 : f32 to vector<16x8xf32>
      %c0_11 = arith.constant 0 : index
      %c0_12 = arith.constant 0 : index
      %13 = vector.load %arg5[%c0_11, %c0_12] : memref<16x8xf32, #tpu.memory_space<vmem>>, vector<16x8xf32>
      tpu.vector_store %arg5[%c0_11, %c0_12], %12 {strides = array<i32>} : memref<16x8xf32, #tpu.memory_space<vmem>>, vector<16x8xf32>,
    } else {
    }
    %c0 = arith.constant 0 : index
    %c0_1 = arith.constant 0 : index
    %3 = vector.load %arg5[%c0, %c0_1] : memref<16x8xf32, #tpu.memory_space<vmem>>, vector<16x8xf32>
    %c0_2 = arith.constant 0 : index
    %c0_3 = arith.constant 0 : index
    %c0_4 = arith.constant 0 : index
    %c0_5 = arith.constant 0 : index
    %4 = vector.load %arg3[%c0_2, %c0_3, %c0_4, %c0_5] : memref<1x16x8x64xf32, #tpu.memory_space<vmem>>, vector<1x16x8x64xf32>
    %5 = vector.shape_cast %4 : vector<1x16x8x64xf32> to vector<16x8x64xf32>
    %cst = arith.constant dense<0.000000e+00> : vector<16x8xf32>
    %6 = vector.multi_reduction <add>, %5, %cst [2] : vector<16x8x64xf32> to vector<16x8xf32>
    %7 = arith.addf %3, %6 : vector<16x8xf32>
    %c0_6 = arith.constant 0 : index
    %c0_7 = arith.constant 0 : index
    %8 = vector.load %arg5[%c0_6, %c0_7] : memref<16x8xf32, #tpu.memory_space<vmem>>, vector<16x8xf32>
    tpu.vector_store %arg5[%c0_6, %c0_7], %7 {strides = array<i32>} : memref<16x8xf32, #tpu.memory_space<vmem>>, vector<16x8xf32>,
    %c0_i32_8 = arith.constant 0 : i32
    %9 = arith.cmpi eq, %arg2, %c0_i32_8 : i32
    %10 = arith.extui %9 : i1 to i32
    %c0_i32_9 = arith.constant 0 : i32
    %11 = arith.cmpi ne, %10, %c0_i32_9 : i32
    scf.if %11 {
      %c0_10 = arith.constant 0 : index
      %c0_11 = arith.constant 0 : index
      %12 = vector.load %arg5[%c0_10, %c0_11] : memref<16x8xf32, #tpu.memory_space<vmem>>, vector<16x8xf32>
      %cst_12 = arith.constant 1.562500e-02 : f32
      %13 = vector.broadcast %cst_12 : f32 to vector<16x8xf32>
      %14 = arith.mulf %12, %13 : vector<16x8xf32>
      %c0_13 = arith.constant 0 : index
      %c0_14 = arith.constant 0 : index
      %c0_15 = arith.constant 0 : index
      %15 = vector.load %arg4[%c0_13, %c0_14, %c0_15] : memref<1x16x8xf32, #tpu.memory_space<vmem>>, vector<1x16x8xf32>
      %16 = vector.shape_cast %15 : vector<1x16x8xf32> to vector<16x8xf32>
      %17 = vector.shape_cast %14 : vector<16x8xf32> to vector<1x16x8xf32>
      tpu.vector_store %arg4[%c0_13, %c0_14, %c0_15], %17 {strides = array<i32>} : memref<1x16x8xf32, #tpu.memory_space<vmem>>, vector<1x16x8xf32>,
    } else {
    }
    return
  }
  func.func @transform_0(%arg0: i32, %arg1: i32, %arg2: i32) -> (i32, i32, i32, i32) {
    %c0_i32 = arith.constant 0 : i32
    %c0_i32_0 = arith.constant 0 : i32
    return %arg0, %arg1, %c0_i32, %arg2 : i32, i32, i32, i32
  }
  func.func @transform_1(%arg0: i32, %arg1: i32, %arg2: i32) -> (i32, i32, i32) {
    %c0_i32 = arith.constant 0 : i32
    %c0_i32_0 = arith.constant 0 : i32
    return %arg0, %arg1, %c0_i32 : i32, i32, i32
  }
}

module attributes {stable_mosaic.version = 11 : i64} {
  func.func @_spectral_mix_kernel(%arg0: i32, %arg1: i32, %arg2: i32, %arg3: memref<1x8x8xf32, #tpu.memory_space<vmem>>, %arg4: memref<1x8x8x64xf32, #tpu.memory_space<vmem>>, %arg5: memref<1x8x8x64xbf16, #tpu.memory_space<vmem>>) attributes {dimension_semantics = [#tpu.dimension_semantics<parallel>, #tpu.dimension_semantics<parallel>, #tpu.dimension_semantics<parallel>], iteration_bounds = array<i64: 2, 2, 1>, scalar_prefetch = 0 : i64, scratch_operands = 0 : i64, tpu.core_type = #tpu.core_type<tc>, window_params = [{transform_indices = @transform_0, window_bounds = array<i64: 1, 8, 8>}, {transform_indices = @transform_1, window_bounds = array<i64: 1, 8, 8, 64>}, {transform_indices = @transform_2, window_bounds = array<i64: 1, 8, 8, 64>}]} {
    %c0 = arith.constant 0 : index
    %c0_0 = arith.constant 0 : index
    %c0_1 = arith.constant 0 : index
    %0 = vector.load %arg3[%c0, %c0_0, %c0_1] : memref<1x8x8xf32, #tpu.memory_space<vmem>>, vector<1x8x8xf32>
    %1 = vector.shape_cast %0 : vector<1x8x8xf32> to vector<8x8xf32>
    %c0_2 = arith.constant 0 : index
    %c0_3 = arith.constant 0 : index
    %c0_4 = arith.constant 0 : index
    %c0_5 = arith.constant 0 : index
    %2 = vector.load %arg4[%c0_2, %c0_3, %c0_4, %c0_5] : memref<1x8x8x64xf32, #tpu.memory_space<vmem>>, vector<1x1x8x64xf32>
    %3 = vector.shape_cast %2 : vector<1x1x8x64xf32> to vector<8x64xf32>
    %cst = arith.constant dense<0.000000e+00> : vector<8x64xf32>
    %4 = tpu.matmul %1, %3, %cst {dimension_numbers = #tpu.dot_dimension_numbers<[1], [0], [0], [1], [0, 0, 1, 1], [], []>} : vector<8x8xf32>, vector<8x64xf32>, vector<8x64xf32> -> vector<8x64xf32>
    %5 = arith.truncf %4 : vector<8x64xf32> to vector<8x64xbf16>
    %c0_6 = arith.constant 0 : index
    %c0_7 = arith.constant 0 : index
    %c0_8 = arith.constant 0 : index
    %c0_9 = arith.constant 0 : index
    %6 = vector.load %arg5[%c0_6, %c0_7, %c0_8, %c0_9] : memref<1x8x8x64xbf16, #tpu.memory_space<vmem>>, vector<1x1x8x64xbf16>
    %7 = vector.shape_cast %6 : vector<1x1x8x64xbf16> to vector<8x64xbf16>
    %8 = vector.shape_cast %5 : vector<8x64xbf16> to vector<1x1x8x64xbf16>
    tpu.vector_store %arg5[%c0_6, %c0_7, %c0_8, %c0_9], %8 {strides = array<i32>} : memref<1x8x8x64xbf16, #tpu.memory_space<vmem>>, vector<1x1x8x64xbf16>,
    %c0_10 = arith.constant 0 : index
    %c1 = arith.constant 1 : index
    %c0_11 = arith.constant 0 : index
    %c0_12 = arith.constant 0 : index
    %9 = vector.load %arg4[%c0_10, %c1, %c0_11, %c0_12] : memref<1x8x8x64xf32, #tpu.memory_space<vmem>>, vector<1x1x8x64xf32>
    %10 = vector.shape_cast %9 : vector<1x1x8x64xf32> to vector<8x64xf32>
    %cst_13 = arith.constant dense<0.000000e+00> : vector<8x64xf32>
    %11 = tpu.matmul %1, %10, %cst_13 {dimension_numbers = #tpu.dot_dimension_numbers<[1], [0], [0], [1], [0, 0, 1, 1], [], []>} : vector<8x8xf32>, vector<8x64xf32>, vector<8x64xf32> -> vector<8x64xf32>
    %12 = arith.truncf %11 : vector<8x64xf32> to vector<8x64xbf16>
    %c0_14 = arith.constant 0 : index
    %c1_15 = arith.constant 1 : index
    %c0_16 = arith.constant 0 : index
    %c0_17 = arith.constant 0 : index
    %13 = vector.load %arg5[%c0_14, %c1_15, %c0_16, %c0_17] : memref<1x8x8x64xbf16, #tpu.memory_space<vmem>>, vector<1x1x8x64xbf16>
    %14 = vector.shape_cast %13 : vector<1x1x8x64xbf16> to vector<8x64xbf16>
    %15 = vector.shape_cast %12 : vector<8x64xbf16> to vector<1x1x8x64xbf16>
    tpu.vector_store %arg5[%c0_14, %c1_15, %c0_16, %c0_17], %15 {strides = array<i32>} : memref<1x8x8x64xbf16, #tpu.memory_space<vmem>>, vector<1x1x8x64xbf16>,
    %c0_18 = arith.constant 0 : index
    %c2 = arith.constant 2 : index
    %c0_19 = arith.constant 0 : index
    %c0_20 = arith.constant 0 : index
    %16 = vector.load %arg4[%c0_18, %c2, %c0_19, %c0_20] : memref<1x8x8x64xf32, #tpu.memory_space<vmem>>, vector<1x1x8x64xf32>
    %17 = vector.shape_cast %16 : vector<1x1x8x64xf32> to vector<8x64xf32>
    %cst_21 = arith.constant dense<0.000000e+00> : vector<8x64xf32>
    %18 = tpu.matmul %1, %17, %cst_21 {dimension_numbers = #tpu.dot_dimension_numbers<[1], [0], [0], [1], [0, 0, 1, 1], [], []>} : vector<8x8xf32>, vector<8x64xf32>, vector<8x64xf32> -> vector<8x64xf32>
    %19 = arith.truncf %18 : vector<8x64xf32> to vector<8x64xbf16>
    %c0_22 = arith.constant 0 : index
    %c2_23 = arith.constant 2 : index
    %c0_24 = arith.constant 0 : index
    %c0_25 = arith.constant 0 : index
    %20 = vector.load %arg5[%c0_22, %c2_23, %c0_24, %c0_25] : memref<1x8x8x64xbf16, #tpu.memory_space<vmem>>, vector<1x1x8x64xbf16>
    %21 = vector.shape_cast %20 : vector<1x1x8x64xbf16> to vector<8x64xbf16>
    %22 = vector.shape_cast %19 : vector<8x64xbf16> to vector<1x1x8x64xbf16>
    tpu.vector_store %arg5[%c0_22, %c2_23, %c0_24, %c0_25], %22 {strides = array<i32>} : memref<1x8x8x64xbf16, #tpu.memory_space<vmem>>, vector<1x1x8x64xbf16>,
    %c0_26 = arith.constant 0 : index
    %c3 = arith.constant 3 : index
    %c0_27 = arith.constant 0 : index
    %c0_28 = arith.constant 0 : index
    %23 = vector.load %arg4[%c0_26, %c3, %c0_27, %c0_28] : memref<1x8x8x64xf32, #tpu.memory_space<vmem>>, vector<1x1x8x64xf32>
    %24 = vector.shape_cast %23 : vector<1x1x8x64xf32> to vector<8x64xf32>
    %cst_29 = arith.constant dense<0.000000e+00> : vector<8x64xf32>
    %25 = tpu.matmul %1, %24, %cst_29 {dimension_numbers = #tpu.dot_dimension_numbers<[1], [0], [0], [1], [0, 0, 1, 1], [], []>} : vector<8x8xf32>, vector<8x64xf32>, vector<8x64xf32> -> vector<8x64xf32>
    %26 = arith.truncf %25 : vector<8x64xf32> to vector<8x64xbf16>
    %c0_30 = arith.constant 0 : index
    %c3_31 = arith.constant 3 : index
    %c0_32 = arith.constant 0 : index
    %c0_33 = arith.constant 0 : index
    %27 = vector.load %arg5[%c0_30, %c3_31, %c0_32, %c0_33] : memref<1x8x8x64xbf16, #tpu.memory_space<vmem>>, vector<1x1x8x64xbf16>
    %28 = vector.shape_cast %27 : vector<1x1x8x64xbf16> to vector<8x64xbf16>
    %29 = vector.shape_cast %26 : vector<8x64xbf16> to vector<1x1x8x64xbf16>
    tpu.vector_store %arg5[%c0_30, %c3_31, %c0_32, %c0_33], %29 {strides = array<i32>} : memref<1x8x8x64xbf16, #tpu.memory_space<vmem>>, vector<1x1x8x64xbf16>,
    %c0_34 = arith.constant 0 : index
    %c4 = arith.constant 4 : index
    %c0_35 = arith.constant 0 : index
    %c0_36 = arith.constant 0 : index
    %30 = vector.load %arg4[%c0_34, %c4, %c0_35, %c0_36] : memref<1x8x8x64xf32, #tpu.memory_space<vmem>>, vector<1x1x8x64xf32>
    %31 = vector.shape_cast %30 : vector<1x1x8x64xf32> to vector<8x64xf32>
    %cst_37 = arith.constant dense<0.000000e+00> : vector<8x64xf32>
    %32 = tpu.matmul %1, %31, %cst_37 {dimension_numbers = #tpu.dot_dimension_numbers<[1], [0], [0], [1], [0, 0, 1, 1], [], []>} : vector<8x8xf32>, vector<8x64xf32>, vector<8x64xf32> -> vector<8x64xf32>
    %33 = arith.truncf %32 : vector<8x64xf32> to vector<8x64xbf16>
    %c0_38 = arith.constant 0 : index
    %c4_39 = arith.constant 4 : index
    %c0_40 = arith.constant 0 : index
    %c0_41 = arith.constant 0 : index
    %34 = vector.load %arg5[%c0_38, %c4_39, %c0_40, %c0_41] : memref<1x8x8x64xbf16, #tpu.memory_space<vmem>>, vector<1x1x8x64xbf16>
    %35 = vector.shape_cast %34 : vector<1x1x8x64xbf16> to vector<8x64xbf16>
    %36 = vector.shape_cast %33 : vector<8x64xbf16> to vector<1x1x8x64xbf16>
    tpu.vector_store %arg5[%c0_38, %c4_39, %c0_40, %c0_41], %36 {strides = array<i32>} : memref<1x8x8x64xbf16, #tpu.memory_space<vmem>>, vector<1x1x8x64xbf16>,
    %c0_42 = arith.constant 0 : index
    %c5 = arith.constant 5 : index
    %c0_43 = arith.constant 0 : index
    %c0_44 = arith.constant 0 : index
    %37 = vector.load %arg4[%c0_42, %c5, %c0_43, %c0_44] : memref<1x8x8x64xf32, #tpu.memory_space<vmem>>, vector<1x1x8x64xf32>
    %38 = vector.shape_cast %37 : vector<1x1x8x64xf32> to vector<8x64xf32>
    %cst_45 = arith.constant dense<0.000000e+00> : vector<8x64xf32>
    %39 = tpu.matmul %1, %38, %cst_45 {dimension_numbers = #tpu.dot_dimension_numbers<[1], [0], [0], [1], [0, 0, 1, 1], [], []>} : vector<8x8xf32>, vector<8x64xf32>, vector<8x64xf32> -> vector<8x64xf32>
    %40 = arith.truncf %39 : vector<8x64xf32> to vector<8x64xbf16>
    %c0_46 = arith.constant 0 : index
    %c5_47 = arith.constant 5 : index
    %c0_48 = arith.constant 0 : index
    %c0_49 = arith.constant 0 : index
    %41 = vector.load %arg5[%c0_46, %c5_47, %c0_48, %c0_49] : memref<1x8x8x64xbf16, #tpu.memory_space<vmem>>, vector<1x1x8x64xbf16>
    %42 = vector.shape_cast %41 : vector<1x1x8x64xbf16> to vector<8x64xbf16>
    %43 = vector.shape_cast %40 : vector<8x64xbf16> to vector<1x1x8x64xbf16>
    tpu.vector_store %arg5[%c0_46, %c5_47, %c0_48, %c0_49], %43 {strides = array<i32>} : memref<1x8x8x64xbf16, #tpu.memory_space<vmem>>, vector<1x1x8x64xbf16>,
    %c0_50 = arith.constant 0 : index
    %c6 = arith.constant 6 : index
    %c0_51 = arith.constant 0 : index
    %c0_52 = arith.constant 0 : index
    %44 = vector.load %arg4[%c0_50, %c6, %c0_51, %c0_52] : memref<1x8x8x64xf32, #tpu.memory_space<vmem>>, vector<1x1x8x64xf32>
    %45 = vector.shape_cast %44 : vector<1x1x8x64xf32> to vector<8x64xf32>
    %cst_53 = arith.constant dense<0.000000e+00> : vector<8x64xf32>
    %46 = tpu.matmul %1, %45, %cst_53 {dimension_numbers = #tpu.dot_dimension_numbers<[1], [0], [0], [1], [0, 0, 1, 1], [], []>} : vector<8x8xf32>, vector<8x64xf32>, vector<8x64xf32> -> vector<8x64xf32>
    %47 = arith.truncf %46 : vector<8x64xf32> to vector<8x64xbf16>
    %c0_54 = arith.constant 0 : index
    %c6_55 = arith.constant 6 : index
    %c0_56 = arith.constant 0 : index
    %c0_57 = arith.constant 0 : index
    %48 = vector.load %arg5[%c0_54, %c6_55, %c0_56, %c0_57] : memref<1x8x8x64xbf16, #tpu.memory_space<vmem>>, vector<1x1x8x64xbf16>
    %49 = vector.shape_cast %48 : vector<1x1x8x64xbf16> to vector<8x64xbf16>
    %50 = vector.shape_cast %47 : vector<8x64xbf16> to vector<1x1x8x64xbf16>
    tpu.vector_store %arg5[%c0_54, %c6_55, %c0_56, %c0_57], %50 {strides = array<i32>} : memref<1x8x8x64xbf16, #tpu.memory_space<vmem>>, vector<1x1x8x64xbf16>,
    %c0_58 = arith.constant 0 : index
    %c7 = arith.constant 7 : index
    %c0_59 = arith.constant 0 : index
    %c0_60 = arith.constant 0 : index
    %51 = vector.load %arg4[%c0_58, %c7, %c0_59, %c0_60] : memref<1x8x8x64xf32, #tpu.memory_space<vmem>>, vector<1x1x8x64xf32>
    %52 = vector.shape_cast %51 : vector<1x1x8x64xf32> to vector<8x64xf32>
    %cst_61 = arith.constant dense<0.000000e+00> : vector<8x64xf32>
    %53 = tpu.matmul %1, %52, %cst_61 {dimension_numbers = #tpu.dot_dimension_numbers<[1], [0], [0], [1], [0, 0, 1, 1], [], []>} : vector<8x8xf32>, vector<8x64xf32>, vector<8x64xf32> -> vector<8x64xf32>
    %54 = arith.truncf %53 : vector<8x64xf32> to vector<8x64xbf16>
    %c0_62 = arith.constant 0 : index
    %c7_63 = arith.constant 7 : index
    %c0_64 = arith.constant 0 : index
    %c0_65 = arith.constant 0 : index
    %55 = vector.load %arg5[%c0_62, %c7_63, %c0_64, %c0_65] : memref<1x8x8x64xbf16, #tpu.memory_space<vmem>>, vector<1x1x8x64xbf16>
    %56 = vector.shape_cast %55 : vector<1x1x8x64xbf16> to vector<8x64xbf16>
    %57 = vector.shape_cast %54 : vector<8x64xbf16> to vector<1x1x8x64xbf16>
    tpu.vector_store %arg5[%c0_62, %c7_63, %c0_64, %c0_65], %57 {strides = array<i32>} : memref<1x8x8x64xbf16, #tpu.memory_space<vmem>>, vector<1x1x8x64xbf16>,
    return
  }
  func.func @transform_0(%arg0: i32, %arg1: i32, %arg2: i32) -> (i32, i32, i32) {
    %c0_i32 = arith.constant 0 : i32
    %c0_i32_0 = arith.constant 0 : i32
    %c0_i32_1 = arith.constant 0 : i32
    return %arg0, %c0_i32, %c0_i32_0 : i32, i32, i32
  }
  func.func @transform_1(%arg0: i32, %arg1: i32, %arg2: i32) -> (i32, i32, i32, i32) {
    %c0_i32 = arith.constant 0 : i32
    %c0_i32_0 = arith.constant 0 : i32
    return %arg0, %arg1, %c0_i32, %arg2 : i32, i32, i32, i32
  }
  func.func @transform_2(%arg0: i32, %arg1: i32, %arg2: i32) -> (i32, i32, i32, i32) {
    %c0_i32 = arith.constant 0 : i32
    %c0_i32_0 = arith.constant 0 : i32
    return %arg0, %arg1, %c0_i32, %arg2 : i32, i32, i32, i32
  }
}

module attributes {stable_mosaic.version = 11 : i64} {
  func.func @_chain_ffn_kernel(%arg0: i32, %arg1: i32, %arg2: memref<1x16x512xbf16, #tpu.memory_space<vmem>>, %arg3: memref<1x16x512xf32, #tpu.memory_space<vmem>>, %arg4: memref<16x16xf32, #tpu.memory_space<vmem>>, %arg5: memref<32x16xf32, #tpu.memory_space<vmem>>, %arg6: memref<16x32xf32, #tpu.memory_space<vmem>>, %arg7: memref<16x16xf32, #tpu.memory_space<vmem>>, %arg8: memref<16x16xf32, #tpu.memory_space<vmem>>, %arg9: memref<1x16x512xf32, #tpu.memory_space<vmem>>) attributes {dimension_semantics = [#tpu.dimension_semantics<parallel>, #tpu.dimension_semantics<parallel>], iteration_bounds = array<i64: 2, 1>, scalar_prefetch = 0 : i64, scratch_operands = 0 : i64, tpu.core_type = #tpu.core_type<tc>, window_params = [{transform_indices = @transform_0, window_bounds = array<i64: 1, 16, 512>}, {transform_indices = @transform_1, window_bounds = array<i64: 1, 16, 512>}, {pipeline_mode = #tpu.pipeline_mode<synchronous>, transform_indices = @transform_2, window_bounds = array<i64: 16, 16>}, {pipeline_mode = #tpu.pipeline_mode<synchronous>, transform_indices = @transform_3, window_bounds = array<i64: 32, 16>}, {pipeline_mode = #tpu.pipeline_mode<synchronous>, transform_indices = @transform_4, window_bounds = array<i64: 16, 32>}, {pipeline_mode = #tpu.pipeline_mode<synchronous>, transform_indices = @transform_5, window_bounds = array<i64: 16, 16>}, {pipeline_mode = #tpu.pipeline_mode<synchronous>, transform_indices = @transform_6, window_bounds = array<i64: 16, 16>}, {transform_indices = @transform_7, window_bounds = array<i64: 1, 16, 512>}]} {
    %c0 = arith.constant 0 : index
    %c0_0 = arith.constant 0 : index
    %c0_1 = arith.constant 0 : index
    %0 = vector.load %arg2[%c0, %c0_0, %c0_1] : memref<1x16x512xbf16, #tpu.memory_space<vmem>>, vector<1x16x512xbf16>
    %1 = vector.shape_cast %0 : vector<1x16x512xbf16> to vector<16x512xbf16>
    %2 = arith.extf %1 : vector<16x512xbf16> to vector<16x512xf32>
    %c0_2 = arith.constant 0 : index
    %c0_3 = arith.constant 0 : index
    %3 = vector.load %arg4[%c0_2, %c0_3] : memref<16x16xf32, #tpu.memory_space<vmem>>, vector<16x16xf32>
    %cst = arith.constant dense<0.000000e+00> : vector<16x512xf32>
    %4 = tpu.matmul %3, %2, %cst {dimension_numbers = #tpu.dot_dimension_numbers<[1], [0], [0], [1], [0, 0, 1, 1], [], []>} : vector<16x16xf32>, vector<16x512xf32>, vector<16x512xf32> -> vector<16x512xf32>
    %c0_4 = arith.constant 0 : index
    %c0_5 = arith.constant 0 : index
    %c0_6 = arith.constant 0 : index
    %5 = vector.load %arg3[%c0_4, %c0_5, %c0_6] : memref<1x16x512xf32, #tpu.memory_space<vmem>>, vector<1x16x512xf32>
    %6 = vector.shape_cast %5 : vector<1x16x512xf32> to vector<16x512xf32>
    %7 = arith.addf %4, %6 : vector<16x512xf32>
    %c0_7 = arith.constant 0 : index
    %c0_8 = arith.constant 0 : index
    %8 = vector.load %arg5[%c0_7, %c0_8] : memref<32x16xf32, #tpu.memory_space<vmem>>, vector<32x16xf32>
    %cst_9 = arith.constant dense<0.000000e+00> : vector<32x512xf32>
    %9 = tpu.matmul %8, %7, %cst_9 {dimension_numbers = #tpu.dot_dimension_numbers<[1], [0], [0], [1], [0, 0, 1, 1], [], []>} : vector<32x16xf32>, vector<16x512xf32>, vector<32x512xf32> -> vector<32x512xf32>
    %cst_10 = arith.constant 5.000000e-01 : f32
    %10 = vector.broadcast %cst_10 : f32 to vector<32x512xf32>
    %11 = arith.mulf %10, %9 : vector<32x512xf32>
    %cst_11 = arith.constant 4.471500e-02 : f32
    %12 = vector.broadcast %cst_11 : f32 to vector<32x512xf32>
    %13 = arith.mulf %12, %9 : vector<32x512xf32>
    %14 = arith.mulf %13, %9 : vector<32x512xf32>
    %15 = arith.mulf %14, %9 : vector<32x512xf32>
    %16 = arith.addf %9, %15 : vector<32x512xf32>
    %cst_12 = arith.constant 0.797884583 : f32
    %17 = vector.broadcast %cst_12 : f32 to vector<32x512xf32>
    %18 = arith.mulf %17, %16 : vector<32x512xf32>
    %19 = math.tanh %18 : vector<32x512xf32>
    %cst_13 = arith.constant 1.000000e+00 : f32
    %20 = vector.broadcast %cst_13 : f32 to vector<32x512xf32>
    %21 = arith.addf %20, %19 : vector<32x512xf32>
    %22 = arith.mulf %11, %21 : vector<32x512xf32>
    %c0_14 = arith.constant 0 : index
    %c0_15 = arith.constant 0 : index
    %23 = vector.load %arg6[%c0_14, %c0_15] : memref<16x32xf32, #tpu.memory_space<vmem>>, vector<16x32xf32>
    %cst_16 = arith.constant dense<0.000000e+00> : vector<16x512xf32>
    %24 = tpu.matmul %23, %22, %cst_16 {dimension_numbers = #tpu.dot_dimension_numbers<[1], [0], [0], [1], [0, 0, 1, 1], [], []>} : vector<16x32xf32>, vector<32x512xf32>, vector<16x512xf32> -> vector<16x512xf32>
    %c0_17 = arith.constant 0 : index
    %c0_18 = arith.constant 0 : index
    %25 = vector.load %arg7[%c0_17, %c0_18] : memref<16x16xf32, #tpu.memory_space<vmem>>, vector<16x16xf32>
    %cst_19 = arith.constant dense<0.000000e+00> : vector<16x512xf32>
    %26 = tpu.matmul %25, %7, %cst_19 {dimension_numbers = #tpu.dot_dimension_numbers<[1], [0], [0], [1], [0, 0, 1, 1], [], []>} : vector<16x16xf32>, vector<16x512xf32>, vector<16x512xf32> -> vector<16x512xf32>
    %c0_20 = arith.constant 0 : index
    %c0_21 = arith.constant 0 : index
    %27 = vector.load %arg8[%c0_20, %c0_21] : memref<16x16xf32, #tpu.memory_space<vmem>>, vector<16x16xf32>
    %cst_22 = arith.constant dense<0.000000e+00> : vector<16x512xf32>
    %28 = tpu.matmul %27, %7, %cst_22 {dimension_numbers = #tpu.dot_dimension_numbers<[1], [0], [0], [1], [0, 0, 1, 1], [], []>} : vector<16x16xf32>, vector<16x512xf32>, vector<16x512xf32> -> vector<16x512xf32>
    %29 = arith.negf %28 : vector<16x512xf32>
    %30 = math.exp %29 : vector<16x512xf32>
    %cst_23 = arith.constant 1.000000e+00 : f32
    %31 = vector.broadcast %cst_23 : f32 to vector<16x512xf32>
    %32 = arith.addf %31, %30 : vector<16x512xf32>
    %33 = arith.divf %31, %32 : vector<16x512xf32>
    %34 = arith.mulf %26, %33 : vector<16x512xf32>
    %35 = arith.addf %24, %34 : vector<16x512xf32>
    %c0_24 = arith.constant 0 : index
    %c0_25 = arith.constant 0 : index
    %c0_26 = arith.constant 0 : index
    %36 = vector.load %arg9[%c0_24, %c0_25, %c0_26] : memref<1x16x512xf32, #tpu.memory_space<vmem>>, vector<1x16x512xf32>
    %37 = vector.shape_cast %36 : vector<1x16x512xf32> to vector<16x512xf32>
    %38 = vector.shape_cast %35 : vector<16x512xf32> to vector<1x16x512xf32>
    tpu.vector_store %arg9[%c0_24, %c0_25, %c0_26], %38 {strides = array<i32>} : memref<1x16x512xf32, #tpu.memory_space<vmem>>, vector<1x16x512xf32>,
    return
  }
  func.func @transform_0(%arg0: i32, %arg1: i32) -> (i32, i32, i32) {
    %c0_i32 = arith.constant 0 : i32
    %c0_i32_0 = arith.constant 0 : i32
    return %arg0, %c0_i32, %arg1 : i32, i32, i32
  }
  func.func @transform_1(%arg0: i32, %arg1: i32) -> (i32, i32, i32) {
    %c0_i32 = arith.constant 0 : i32
    %c0_i32_0 = arith.constant 0 : i32
    return %arg0, %c0_i32, %arg1 : i32, i32, i32
  }
  func.func @transform_2(%arg0: i32, %arg1: i32) -> (i32, i32) {
    %c0_i32 = arith.constant 0 : i32
    %c0_i32_0 = arith.constant 0 : i32
    %c0_i32_1 = arith.constant 0 : i32
    return %c0_i32, %c0_i32_0 : i32, i32
  }
  func.func @transform_3(%arg0: i32, %arg1: i32) -> (i32, i32) {
    %c0_i32 = arith.constant 0 : i32
    %c0_i32_0 = arith.constant 0 : i32
    %c0_i32_1 = arith.constant 0 : i32
    return %c0_i32, %c0_i32_0 : i32, i32
  }
  func.func @transform_4(%arg0: i32, %arg1: i32) -> (i32, i32) {
    %c0_i32 = arith.constant 0 : i32
    %c0_i32_0 = arith.constant 0 : i32
    %c0_i32_1 = arith.constant 0 : i32
    return %c0_i32, %c0_i32_0 : i32, i32
  }
  func.func @transform_5(%arg0: i32, %arg1: i32) -> (i32, i32) {
    %c0_i32 = arith.constant 0 : i32
    %c0_i32_0 = arith.constant 0 : i32
    %c0_i32_1 = arith.constant 0 : i32
    return %c0_i32, %c0_i32_0 : i32, i32
  }
  func.func @transform_6(%arg0: i32, %arg1: i32) -> (i32, i32) {
    %c0_i32 = arith.constant 0 : i32
    %c0_i32_0 = arith.constant 0 : i32
    %c0_i32_1 = arith.constant 0 : i32
    return %c0_i32, %c0_i32_0 : i32, i32
  }
  func.func @transform_7(%arg0: i32, %arg1: i32) -> (i32, i32, i32) {
    %c0_i32 = arith.constant 0 : i32
    %c0_i32_0 = arith.constant 0 : i32
    return %arg0, %c0_i32, %arg1 : i32, i32, i32
  }
}

</mosaic_0001>

<bundles_post_ra>
// kernel: transformer_block_forward.3
= control target key start
LH: loop header
LB: loop body
LE: loop exit
PB: predicated region body
PF: predicated region fallthrough
CT: control target
= control target key end

     0   :  { %s533_s6 = smov 0   ;;  %s535_s7 = smov 0   ;;  %s620_s0 = inlined_call_operand.vmem [shape: f32[2,16,8,64], index: 0, kind: input, shape index: {}]   ;;  %s621_s1 = inlined_call_operand.vmem [shape: f32[2,16,8], index: 1, kind: output, shape index: {}]  }
   0x1   :  { %s537_s8 = smov 0  }
   0x2 LB: > { %s30_s9 = sadd.s32 1, %s516_s7  ;;  %p464_p0 = scmp.ge.s32.totalorder %s520_s8, 1  ;;  %s520_s8 = sphi %s537_s8, %s11_s8   ;;  %s516_s7 = sphi %s535_s7, %s623_s7   ;;  %s512_s6 = sphi %s533_s6, %s622_s6  }
   0x3   : > { %p32_p1 = scmp.ge.s32.totalorder %s30_s9, 2  ;;  %p120_p2 = scmp.lt.s32.totalorder %s520_s8, 3 }
   0x5   : > { %s625_s9 = smov (%p32_p1, %s30_s9), 0  ;;  %p121_p3 = pnand %p464_p0, %p120_p2 }
   0x6   : > { %p152_p4 = scmp.lt.s32.totalorder (!%p121_p3), %s512_s6, 1  ;;  %vm199_vm0 = vcmask (!%p121_p3), 523264   ;;  %vm178_vm1 = vcmask (!%p121_p3), 64512   ;;  %v522_v32 = vmov (!%p121_p3), 0.0   ;;  %v264_v39 = vlaneseq (!%p121_p3) }
   0x7   : > { %124 = sbr.rel (%p121_p3) target bundleno = 206 (0xce), region = 24  ;;  %180 = vst.msk [vmem:[#allocation2 + $0x8] sm:$0xff] (!%p121_p3), %vm178_vm1, %v522_v32  ;;  %179 = vst.msk [vmem:[#allocation2] sm:$0xff] (!%p121_p3), %vm178_vm1, %v522_v32  ;;  %vm330_vm2 = vcmask (!%p121_p3), 1041409   ;;  %vm332_vm3 = vcmask (!%p121_p3), 1042434   ;;  %vm334_vm4 = vcmask (!%p121_p3), 1043459  }
   0x8   : > { %v265_v42 = vand.u32 (!%p121_p3), 127, %v264_v39  ;;  %v267_v43 = vshrl.u32 (!%p121_p3), %v264_v39, 7  ;;  %vm336_vm5 = vcmask (!%p121_p3), 1044484   ;;  %vm338_vm6 = vcmask (!%p121_p3), 1045509  }
   0x9   : > { %vm340_vm7 = vcmask (!%p121_p3), 1046534   ;;  %vm342_vm8 = vcmask (!%p121_p3), 1047559  }
   0xa   : > { %v268_v46 = vsub.s32 (!%p121_p3), %v265_v42, %v267_v43 }
   0xe   : > { %s627_s6 = smov (!%p152_p4, %s512_s6), 1 }
   0xf   : > { %s471_s10 = sshll.u32 %s627_s6, 7  ;;  %s472_s14 = sshll.u32 %s627_s6, 4 }
  0x10   : > { %s557_s13 = scalar_lea.vmem %s620_s0, %s471_s10  ;;  %s172_s17 = scalar_lea.vmem %s621_s1, %s472_s14 }
  0x11   : > { %v191_v0 = vld [vmem:[%s557_s13 + $0x40] sm:$0xff]  ;;  %v192_v2 = vld [vmem:[%s557_s13 + $0x48] sm:$0xff]  ;;  %v193_v8 = vld [vmem:[%s557_s13 + $0x50] sm:$0xff] }
  0x12   : > { %v183_v1 = vld [vmem:[%s557_s13] sm:$0xff]  ;;  %v224_v3 = vsel %vm199_vm0, %v191_v0, 0.0  ;;  %v184_v5 = vld [vmem:[%s557_s13 + $0x8] sm:$0xff]  ;;  %v227_v6 = vsel %vm199_vm0, %v192_v2, 0.0  ;;  %v185_v9 = vld [vmem:[%s557_s13 + $0x10] sm:$0xff]  ;;  %v230_v10 = vsel %vm199_vm0, %v193_v8, 0.0 }
  0x13   : > { %v200_v4 = vsel %vm199_vm0, %v183_v1, 0.0  ;;  %225 = vadd.xlane.f32.xlu1 %v224_v3  ;;  %v203_v7 = vsel %vm199_vm0, %v184_v5, 0.0  ;;  %v206_v11 = vsel %vm199_vm0, %v185_v9, 0.0  ;;  %v194_v12 = vld [vmem:[%s557_s13 + $0x58] sm:$0xff]  ;;  %v195_v16 = vld [vmem:[%s557_s13 + $0x60] sm:$0xff]  ;;  %v196_v20 = vld [vmem:[%s557_s13 + $0x68] sm:$0xff] }
  0x14   : > { %201 = vadd.xlane.f32.xlu0 %v200_v4  ;;  %v186_v13 = vld [vmem:[%s557_s13 + $0x18] sm:$0xff]  ;;  %v233_v14 = vsel %vm199_vm0, %v194_v12, 0.0  ;;  %v187_v17 = vld [vmem:[%s557_s13 + $0x20] sm:$0xff]  ;;  %v236_v18 = vsel %vm199_vm0, %v195_v16, 0.0  ;;  %v188_v21 = vld [vmem:[%s557_s13 + $0x28] sm:$0xff]  ;;  %v239_v22 = vsel %vm199_vm0, %v196_v20, 0.0 }
  0x15   : > { %v209_v15 = vsel %vm199_vm0, %v186_v13, 0.0  ;;  %v212_v19 = vsel %vm199_vm0, %v187_v17, 0.0  ;;  %v215_v23 = vsel %vm199_vm0, %v188_v21, 0.0  ;;  %v197_v24 = vld [vmem:[%s557_s13 + $0x70] sm:$0xff]  ;;  %v198_v28 = vld [vmem:[%s557_s13 + $0x78] sm:$0xff]  ;;  %v182_v13 = vld [vmem:[#allocation2 + $0x8] sm:$0xff] }
  0x16   : > { %v189_v25 = vld [vmem:[%s557_s13 + $0x30] sm:$0xff]  ;;  %v242_v26 = vsel %vm199_vm0, %v197_v24, 0.0  ;;  %v190_v29 = vld [vmem:[%s557_s13 + $0x38] sm:$0xff]  ;;  %v245_v30 = vsel %vm199_vm0, %v198_v28, 0.0 }
  0x17   : > { %228 = vadd.xlane.f32.xlu1 %v227_v6  ;;  %v218_v27 = vsel %vm199_vm0, %v189_v25, 0.0  ;;  %v221_v31 = vsel %vm199_vm0, %v190_v29, 0.0 }
  0x18   : > { %204 = vadd.xlane.f32.xlu0 %v203_v7 }
  0x1b   : > { %231 = vadd.xlane.f32.xlu1 %v230_v10 }
  0x1c   : > { %207 = vadd.xlane.f32.xlu0 %v206_v11 }
  0x1f   : > { %234 = vadd.xlane.f32.xlu1 %v233_v14 }
  0x20   : > { %210 = vadd.xlane.f32.xlu0 %v209_v15  ;;  %v181_v15 = vld [vmem:[#allocation2] sm:$0xff] }
  0x23   : > { %237 = vadd.xlane.f32.xlu1 %v236_v18 }
  0x24   : > { %213 = vadd.xlane.f32.xlu0 %v212_v19 }
  0x27   : > { %240 = vadd.xlane.f32.xlu1 %v239_v22 }
  0x28   : > { %216 = vadd.xlane.f32.xlu0 %v215_v23 }
  0x2b   : > { %243 = vadd.xlane.f32.xlu1 %v242_v26 }
  0x2c   : > { %219 = vadd.xlane.f32.xlu0 %v218_v27 }
  0x2f   : > { %246 = vadd.xlane.f32.xlu1 %v245_v30 }
  0x30   : > { %222 = vadd.xlane.f32.xlu0 %v221_v31 }
  0xa0   : > { %v226_v33 = vpop.xlane.xlu1 %225 }
  0xa1   : > { %v202_v34 = vpop.xlane.xlu0 %201  ;;  %v301_v53 = vrot.slane %v226_v33, %v268_v46 }
  0xa2   : > { %v269_v54 = vrot.slane %v202_v34, %v268_v46 }
  0xa4   : > { %v229_v35 = vpop.xlane.xlu1 %228 }
  0xa5   : > { %v205_v36 = vpop.xlane.xlu0 %204  ;;  %v305_v49 = vrot.slane %v229_v35, %v268_v46 }
  0xa6   : > { %v273_v50 = vrot.slane %v205_v36, %v268_v46 }
  0xa7   : > { %v344_v61 = vsel %vm330_vm2, %v305_v49, %v301_v53 }
  0xa8   : > { %v232_v37 = vpop.xlane.xlu1 %231  ;;  %v331_v62 = vsel %vm330_vm2, %v273_v50, %v269_v54 }
  0xa9   : > { %v208_v38 = vpop.xlane.xlu0 %207  ;;  %v309_v51 = vrot.slane %v232_v37, %v268_v46 }
  0xaa   : > { %v277_v52 = vrot.slane %v208_v38, %v268_v46 }
  0xab   : > { %v345_v1 = vsel %vm332_vm3, %v309_v51, %v344_v61 }
  0xac   : > { %v235_v40 = vpop.xlane.xlu1 %234  ;;  %v333_v2 = vsel %vm332_vm3, %v277_v52, %v331_v62 }
  0xad   : > { %v211_v41 = vpop.xlane.xlu0 %210  ;;  %v313_v55 = vrot.slane %v235_v40, %v268_v46 }
  0xae   : > { %v281_v56 = vrot.slane %v211_v41, %v268_v46 }
  0xaf   : > { %v346_v5 = vsel %vm334_vm4, %v313_v55, %v345_v1 }
  0xb0   : > { %v238_v44 = vpop.xlane.xlu1 %237  ;;  %v335_v6 = vsel %vm334_vm4, %v281_v56, %v333_v2 }
  0xb1   : > { %v214_v45 = vpop.xlane.xlu0 %213  ;;  %v317_v57 = vrot.slane %v238_v44, %v268_v46 }
  0xb2   : > { %v285_v58 = vrot.slane %v214_v45, %v268_v46 }
  0xb3   : > { %v347_v7 = vsel %vm336_vm5, %v317_v57, %v346_v5 }
  0xb4   : > { %v241_v47 = vpop.xlane.xlu1 %240  ;;  %v337_v8 = vsel %vm336_vm5, %v285_v58, %v335_v6 }
  0xb5   : > { %v217_v48 = vpop.xlane.xlu0 %216  ;;  %v321_v63 = vrot.slane %v241_v47, %v268_v46 }
  0xb6   : > { %v289_v0 = vrot.slane %v217_v48, %v268_v46 }
  0xb7   : > { %v348_v11 = vsel %vm338_vm6, %v321_v63, %v347_v7 }
  0xb8   : > { %v244_v59 = vpop.xlane.xlu1 %243  ;;  %v339_v12 = vsel %vm338_vm6, %v289_v0, %v337_v8 }
  0xb9   : > { %v220_v60 = vpop.xlane.xlu0 %219  ;;  %v325_v3 = vrot.slane %v244_v59, %v268_v46 }
  0xba   : > { %v293_v4 = vrot.slane %v220_v60, %v268_v46 }
  0xbb   : > { %v349_v17 = vsel %vm340_vm7, %v325_v3, %v348_v11 }
  0xbc   : > { %v247_v9 = vpop.xlane.xlu1 %246  ;;  %v341_v18 = vsel %vm340_vm7, %v293_v4, %v339_v12 }
  0xbd   : > { %v223_v10 = vpop.xlane.xlu0 %222  ;;  %v329_v14 = vrot.slane %v247_v9, %v268_v46 }
  0xbe   : > { %v297_v16 = vrot.slane %v223_v10, %v268_v46 }
  0xbf   : > { %v350_v19 = vsel %vm342_vm8, %v329_v14, %v349_v17 }
  0xc0   : > { %v343_v20 = vsel %vm342_vm8, %v297_v16, %v341_v18  ;;  %v354_v21 = vadd.f32 %v350_v19, %v182_v13 }
  0xc1   : > { %v353_v22 = vadd.f32 %v343_v20, %v181_v15 }
  0xc2   : > { %357 = vst.msk [vmem:[#allocation2 + $0x8] sm:$0xff] %vm178_vm1, %v354_v21 }
  0xc3   : > { %356 = vst.msk [vmem:[#allocation2] sm:$0xff] %vm178_vm1, %v353_v22 }
  0xc9   : > { %v362_v23 = vld [vmem:[#allocation2 + $0x8] sm:$0xff] }
  0xca   : > { %v361_v24 = vld [vmem:[#allocation2] sm:$0xff]  ;;  %v364_v25 = vmul.f32 0.015625, %v362_v23 }
  0xcb   : > { %v363_v26 = vmul.f32 0.015625, %v361_v24 }
  0xcc   : > { %366 = vst.msk [vmem:[%s172_s17 + $0x8] sm:$0xff] %vm178_vm1, %v364_v25 }
  0xcd   : > { %365 = vst.msk [vmem:[%s172_s17] sm:$0xff] %vm178_vm1, %v363_v26 }
  0xce PF: > { %s11_s8 = sadd.s32 1, %s520_s8   ;;  %s622_s6 = smov %s516_s7 }
  0xcf   : > { %p8_p5 = scmp.ge.s32.totalorder %s11_s8, 4   ;;  %s623_s7 = smov %s625_s9 }
  0xd1   :  { %10 = sbr.rel (!%p8_p5) target bundleno = 2 (0x2), region = 62 }

// kernel: transformer_block_forward.4
= control target key start
LH: loop header
LB: loop body
LE: loop exit
PB: predicated region body
PF: predicated region fallthrough
CT: control target
= control target key end

     0   :  { %s1139_s9 = smov 0   ;;  %s1141_s10 = smov 0   ;;  %s1231_s0 = inlined_call_operand.vmem [shape: f32[2,8,8], index: 0, kind: input, shape index: {}]   ;;  %s1232_s1 = inlined_call_operand.vmem [shape: f32[2,16,8,64], index: 1, kind: input, shape index: {}]   ;;  %s1233_s2 = inlined_call_operand.vmem [shape: bf16[2,16,8,64], index: 2, kind: output, shape index: {}]  }
   0x1   :  { %s1143_s11 = smov 0   ;;  %s1145_s12 = smov 0  }
   0x2   :  { %s1147_s13 = smov 0  }
   0x3 LB: > { %s27_s14 = sadd.s32 1, %s1112_s11  ;;  %s31_s15 = sadd.s32 1, %s1116_s12  ;;  %s1120_s13 = sphi %s1147_s13, %s12_s13   ;;  %s1116_s12 = sphi %s1145_s12, %s1237_s12   ;;  %s1112_s11 = sphi %s1143_s11, %s1236_s11   ;;  %s1108_s10 = sphi %s1141_s10, %s1235_s10   ;;  %s1104_s9 = sphi %s1139_s9, %s1234_s9  }
   0x4   : > { %p29_p0 = scmp.ge.s32.totalorder %s27_s14, 2  ;;  %p952_p1 = scmp.ge.s32.totalorder %s1120_s13, 1 }
   0x5   : > { %p156_p2 = scmp.lt.s32.totalorder %s1120_s13, 5 }
   0x6   : > { %s1239_s14 = smov (%p29_p0, %s27_s14), 0  ;;  %s1241_s15 = smov (!%p29_p0, %s31_s15), %s1116_s12 }
   0x7   : > { %p157_p3 = pnand %p952_p1, %p156_p2  ;;  %p33_p4 = scmp.ge.s32.totalorder %s1241_s15, 2 }
   0x8   : > { %p196_p5 = scmp.lt.s32.totalorder (!%p157_p3), %s1108_s10, 1  ;;  %s954_s16 = sshll.u32 (!%p157_p3), %s1104_s9, 3  ;;  %v1122_v0 = vmov (!%p157_p3), 0.0   ;;  %vm1123_vm0 = vmmov (!%p157_p3), 0   ;;  %vm228_vm1 = vcmask (!%p157_p3), 64512   ;;  %vm303_vm2 = vcmask (!%p157_p3), 519168  }
   0x9   : > { %s1243_s15 = smov (%p33_p4, %s1241_s15), 0  ;;  %160 = sbr.rel (%p157_p3) target bundleno = 250 (0xfa), region = 28 }
   0xa   : > { %1000 = vmatprep.subr.mxu0 (!%p157_p3), %v1122_v0  ;;  %1005 = vmatprep.subr.mxu1 (!%p157_p3), %v1122_v0  ;;  %p203_p6 = scmp.lt.s32.totalorder (!%p157_p3), %s954_s16, 15 }
   0xb   : > { %1002 = vmatprep.mubr.msk.f32.mxu0 (!%p157_p3), %vm1123_vm0, %v1122_v0  ;;  %1007 = vmatprep.mubr.msk.f32.mxu1 (!%p157_p3), %vm1123_vm0, %v1122_v0 }
  0x10   : > { %s1245_s10 = smov (!%p196_p5, %s1108_s10), 1  ;;  %s1247_s16 = smov (!%p203_p6, %s954_s16), 15 }
  0x11   : > { %s955_s17 = sshll.u32 %s1245_s10, 4  ;;  %s953_s18 = sshll.u32 %s1245_s10, 3 }
  0x12   : > { %s1171_s19 = sadd.s32 %s955_s17, %s1247_s16  ;;  %s199_s22 = scalar_lea.vmem %s1231_s0, %s953_s18 }
  0x13   : > { %s956_s23 = sshll.u32 %s1171_s19, 3  ;;  %v226_v1 = vld [vmem:[%s199_s22] sm:$0xff]  ;;  %s959_s27 = sshll.u32 %s1171_s19, 2 }
  0x14   : > { %s211_s26 = scalar_lea.vmem %s1232_s1, %s956_s23  ;;  %s1198_s30 = scalar_lea.vmem %s1233_s2, %s959_s27 }
  0x15   : > { %v227_v2 = vld [vmem:[%s211_s26] sm:$0xff]  ;;  %v961_v3 = vld [vmem:[%s211_s26 + $0x8] sm:$0xff]  ;;  %v964_v4 = vld [vmem:[%s211_s26 + $0x10] sm:$0xff] }
  0x16   : > { %1001 = vmatpush3.msra.mxu0 %v227_v2  ;;  %1006 = vmatpush3.msra.mxu1 %v961_v3  ;;  %v967_v5 = vld [vmem:[%s211_s26 + $0x18] sm:$0xff]  ;;  %v970_v6 = vld [vmem:[%s211_s26 + $0x20] sm:$0xff]  ;;  %v973_v7 = vld [vmem:[%s211_s26 + $0x28] sm:$0xff] }
  0x17   : > { %1003 = vmatmul.mubr.msk.f32.vlgmr.msra.gmra.mrb[0].mxu0 %vm228_vm1, %v226_v1  ;;  %1008 = vmatmul.mubr.msk.f32.vlgmr.msra.gmra.mrb[0].mxu1 %vm228_vm1, %v226_v1  ;;  %v976_v8 = vld [vmem:[%s211_s26 + $0x30] sm:$0xff]  ;;  %v979_v9 = vld [vmem:[%s211_s26 + $0x38] sm:$0xff] }
  0x18   : > { %1010 = vmatprep.subr.mxu0 %v1122_v0  ;;  %1015 = vmatprep.subr.mxu1 %v1122_v0 }
  0x19   : > { %1011 = vmatpush3.msra.mxu0 %v964_v4  ;;  %1016 = vmatpush3.msra.mxu1 %v967_v5 }
  0x1a   : > { %1012 = vmatprep.mubr.msk.f32.mxu0 %vm1123_vm0, %v1122_v0  ;;  %1017 = vmatprep.mubr.msk.f32.mxu1 %vm1123_vm0, %v1122_v0 }
  0x1b   : > { %1013 = vmatmul.mubr.msk.f32.vlgmr.msra.gmra.mrb[2].mxu0 %vm228_vm1, %v226_v1  ;;  %1018 = vmatmul.mubr.msk.f32.vlgmr.msra.gmra.mrb[2].mxu1 %vm228_vm1, %v226_v1 }
  0x1c   : > { %1020 = vmatprep.subr.mxu0 %v1122_v0  ;;  %1025 = vmatprep.subr.mxu1 %v1122_v0 }
  0x1d   : > { %1021 = vmatpush3.msra.mxu0 %v970_v6  ;;  %1026 = vmatpush3.msra.mxu1 %v973_v7 }
  0x1e   : > { %1022 = vmatprep.mubr.msk.f32.mxu0 %vm1123_vm0, %v1122_v0  ;;  %1027 = vmatprep.mubr.msk.f32.mxu1 %vm1123_vm0, %v1122_v0 }
  0x1f   : > { %1023 = vmatmul.mubr.msk.f32.vlgmr.msra.gmra.mrb[4].mxu0 %vm228_vm1, %v226_v1  ;;  %1028 = vmatmul.mubr.msk.f32.vlgmr.msra.gmra.mrb[4].mxu1 %vm228_vm1, %v226_v1 }
  0x20   : > { %1030 = vmatprep.subr.mxu0 %v1122_v0  ;;  %1035 = vmatprep.subr.mxu1 %v1122_v0 }
  0x21   : > { %1031 = vmatpush3.msra.mxu0 %v976_v8  ;;  %1036 = vmatpush3.msra.mxu1 %v979_v9 }
  0x22   : > { %1032 = vmatprep.mubr.msk.f32.mxu0 %vm1123_vm0, %v1122_v0  ;;  %1037 = vmatprep.mubr.msk.f32.mxu1 %vm1123_vm0, %v1122_v0 }
  0x23   : > { %1033 = vmatmul.mubr.msk.f32.vlgmr.msra.gmra.mrb[6].mxu0 %vm228_vm1, %v226_v1  ;;  %1038 = vmatmul.mubr.msk.f32.vlgmr.msra.gmra.mrb[6].mxu1 %vm228_vm1, %v226_v1 }
  0xea   : > { %v298_v10 = vpop.f32.mrb[0].mxu0  ;;  %v373_v11 = vpop.f32.mrb[0].mxu1 }
  0xeb   : > { %v302_v12 = vpack.c.bf16 %v298_v10, %v298_v10  ;;  %v377_v13 = vpack.c.bf16 %v373_v11, %v373_v11  ;;  %v1004_v14 = vpop.f32.mrb[1].mxu0  ;;  %v1009_v15 = vpop.f32.mrb[1].mxu1 }
  0xed   : > { %304 = vst.msk [vmem:[%s1198_s30] sm:$0xf] %vm303_vm2, %v302_v12  ;;  %963 = vst.msk [vmem:[%s1198_s30 + $0x4] sm:$0xf] %vm303_vm2, %v377_v13 }
  0xee   : > { %v448_v16 = vpop.f32.mrb[2].mxu0  ;;  %v523_v17 = vpop.f32.mrb[2].mxu1 }
  0xef   : > { %v452_v18 = vpack.c.bf16 %v448_v16, %v448_v16  ;;  %v527_v19 = vpack.c.bf16 %v523_v17, %v523_v17  ;;  %v1014_v20 = vpop.f32.mrb[3].mxu0  ;;  %v1019_v21 = vpop.f32.mrb[3].mxu1 }
  0xf1   : > { %966 = vst.msk [vmem:[%s1198_s30 + $0x8] sm:$0xf] %vm303_vm2, %v452_v18  ;;  %969 = vst.msk [vmem:[%s1198_s30 + $0xc] sm:$0xf] %vm303_vm2, %v527_v19 }
  0xf2   : > { %v598_v22 = vpop.f32.mrb[4].mxu0  ;;  %v673_v23 = vpop.f32.mrb[4].mxu1 }
  0xf3   : > { %v602_v24 = vpack.c.bf16 %v598_v22, %v598_v22  ;;  %v677_v25 = vpack.c.bf16 %v673_v23, %v673_v23  ;;  %v1024_v26 = vpop.f32.mrb[5].mxu0  ;;  %v1029_v27 = vpop.f32.mrb[5].mxu1 }
  0xf5   : > { %972 = vst.msk [vmem:[%s1198_s30 + $0x10] sm:$0xf] %vm303_vm2, %v602_v24  ;;  %975 = vst.msk [vmem:[%s1198_s30 + $0x14] sm:$0xf] %vm303_vm2, %v677_v25 }
  0xf6   : > { %v748_v28 = vpop.f32.mrb[6].mxu0  ;;  %v823_v29 = vpop.f32.mrb[6].mxu1 }
  0xf7   : > { %v752_v30 = vpack.c.bf16 %v748_v28, %v748_v28  ;;  %v827_v31 = vpack.c.bf16 %v823_v29, %v823_v29  ;;  %v1034_v32 = vpop.f32.mrb[7].mxu0  ;;  %v1039_v33 = vpop.f32.mrb[7].mxu1 }
  0xf9   : > { %978 = vst.msk [vmem:[%s1198_s30 + $0x18] sm:$0xf] %vm303_vm2, %v752_v30  ;;  %981 = vst.msk [vmem:[%s1198_s30 + $0x1c] sm:$0xf] %vm303_vm2, %v827_v31 }
  0xfa PF: > { %s12_s13 = sadd.s32 1, %s1120_s13   ;;  %s1234_s9 = smov %s1112_s11 }
  0xfb   : > { %p9_p7 = scmp.ge.s32.totalorder %s12_s13, 6   ;;  %s1235_s10 = smov %s1116_s12 }
  0xfc   : > { %s1236_s11 = smov %s1239_s14  ;;  %s1237_s12 = smov %s1243_s15 }
  0xfd   :  { %11 = sbr.rel (!%p9_p7) target bundleno = 3 (0x3), region = 75 }

// kernel: transformer_block_forward.5
= control target key start
LH: loop header
LB: loop body
LE: loop exit
PB: predicated region body
PF: predicated region fallthrough
CT: control target
= control target key end

     0   :  { %s1791_s24 = smov 0   ;;  %s1793_s25 = smov 0   ;;  %s2055_s0 = inlined_call_operand.vmem [shape: bf16[2,16,512], index: 0, kind: input, shape index: {}]   ;;  %s2056_s1 = inlined_call_operand.vmem [shape: f32[2,16,512], index: 1, kind: input, shape index: {}]   ;;  %s2057_s2 = inlined_call_operand.vmem [shape: f32[16,16], index: 2, kind: input, shape index: {}]   ;;  %s2058_s3 = inlined_call_operand.vmem [shape: f32[32,16], index: 3, kind: input, shape index: {}]   ;;  %s2059_s4 = inlined_call_operand.vmem [shape: f32[16,32], index: 4, kind: input, shape index: {}]   ;;  %s2060_s5 = inlined_call_operand.vmem [shape: f32[16,16], index: 5, kind: input, shape index: {}]   ;;  %s2061_s6 = inlined_call_operand.vmem [shape: f32[16,16], index: 6, kind: input, shape index: {}]   ;;  %s2062_s7 = inlined_call_operand.vmem [shape: f32[2,16,512], index: 7, kind: output, shape index: {}]  }
   0x1   :  { %s1795_s26 = smov 0  }
   0x2 LB: > { %s29_s27 = sadd.s32 1, %s1744_s25  ;;  %p1535_p0 = scmp.ge.s32.totalorder %s1748_s26, 1  ;;  %s1748_s26 = sphi %s1795_s26, %s17_s26   ;;  %s1744_s25 = sphi %s1793_s25, %s2064_s25   ;;  %s1740_s24 = sphi %s1791_s24, %s2063_s24  }
   0x3   : > { %p31_p1 = scmp.ge.s32.totalorder %s29_s27, 2  ;;  %p275_p2 = scmp.lt.s32.totalorder %s1748_s26, 3 }
   0x5   : > { %s2066_s27 = smov (%p31_p1, %s29_s27), 0  ;;  %p276_p3 = pnand %p1535_p0, %p275_p2 }
   0x6   : > { %p325_p4 = scmp.lt.s32.totalorder (!%p276_p3), %s1740_s24, 1  ;;  %v1750_v0 = vmov (!%p276_p3), 0.0   ;;  %v366_v5 = vld [vmem:[%s2057_s2] sm:$0xff] (!%p276_p3)  ;;  %vm376_vm0 = vcmask (!%p276_p3), 130048   ;;  %v367_v6 = vld [vmem:[%s2057_s2 + $0x8] sm:$0xff] (!%p276_p3)  ;;  %v539_v37 = vld [vmem:[%s2058_s3 + $0x10] sm:$0xff] (!%p276_p3) }
   0x7   : > { %279 = sbr.rel (%p276_p3) target bundleno = 730 (0x2da), region = 48  ;;  %447 = vmatprep.mubr.f32.mxu0 (!%p276_p3), %v1750_v0  ;;  %524 = vmatprep.mubr.f32.mxu1 (!%p276_p3), %v1750_v0  ;;  %v537_v35 = vld [vmem:[%s2058_s3] sm:$0xff] (!%p276_p3)  ;;  %v538_v36 = vld [vmem:[%s2058_s3 + $0x8] sm:$0xff] (!%p276_p3)  ;;  %v540_v38 = vld [vmem:[%s2058_s3 + $0x18] sm:$0xff] (!%p276_p3)  ;;  %vm1257_vm1 = vcmask (!%p276_p3), 261120  }
   0x8   : > { %v877_v39 = vld [vmem:[%s2060_s5] sm:$0xff] (!%p276_p3)  ;;  %v878_v40 = vld [vmem:[%s2060_s5 + $0x8] sm:$0xff] (!%p276_p3) }
   0x9   : > { %v1039_v41 = vld [vmem:[%s2061_s6] sm:$0xff] (!%p276_p3)  ;;  %v1040_v42 = vld [vmem:[%s2061_s6 + $0x8] sm:$0xff] (!%p276_p3) }
   0xe   : > { %s2068_s24 = smov (!%p325_p4, %s1740_s24), 1 }
   0xf   : > { %s1576_s28 = sshll.u32 %s2068_s24, 5  ;;  %s1577_s13 = sshll.u32 %s2068_s24, 6 }
  0x10   : > { %s332_s8 = scalar_lea.vmem %s2055_s0, %s1576_s28  ;;  %s342_s16 = scalar_lea.vmem %s2056_s1, %s1577_s13 }
  0x11   : > { %v1656_v1 = vld [vmem:[%s332_s8 + $0x4] ss:$16 sps:$4 sm:$0xff]   ;;  %v1658_v2 = vld [vmem:[%s332_s8 + $0xc] ss:$16 sps:$4 sm:$0xff]   ;;  %v1660_v3 = vld [vmem:[%s332_s8] ss:$16 sps:$4 sm:$0xff]   ;;  %s352_s21 = scalar_lea.vmem %s2062_s7, %s1577_s13 }
  0x12   : > { %1580 = vmatprep.subr.bf16.mxu0 %v1656_v1  ;;  %v1661_v4 = vld [vmem:[%s332_s8 + $0x8] ss:$16 sps:$4 sm:$0xff]   ;;  %1584 = vmatprep.subr.bf16.mxu1 %v1658_v2  ;;  %v368_v7 = vld [vmem:[%s342_s16] sm:$0xff]  ;;  %v370_v8 = vld [vmem:[%s342_s16 + $0x10] sm:$0xff] }
  0x13   : > { %1582 = vmatpush1.bf16.msra.mxu0 %v1660_v3  ;;  %1586 = vmatpush1.bf16.msra.mxu1 %v1661_v4  ;;  %v369_v9 = vld [vmem:[%s342_s16 + $0x8] sm:$0xff]  ;;  %v371_v10 = vld [vmem:[%s342_s16 + $0x18] sm:$0xff]  ;;  %v372_v19 = vld [vmem:[%s342_s16 + $0x20] sm:$0xff] }
  0x14   : > { %v374_v20 = vld [vmem:[%s342_s16 + $0x30] sm:$0xff]  ;;  %v373_v21 = vld [vmem:[%s342_s16 + $0x28] sm:$0xff]  ;;  %v375_v22 = vld [vmem:[%s342_s16 + $0x38] sm:$0xff] }
  0x16   : > { %1542 = vmatmul.mubr.msk.f32.vlgmr.msra.gmra.mrb[0].mxu0 %vm376_vm0, %v366_v5  ;;  %1544 = vmatmul.mubr.msk.f32.vlgmr.msra.gmra.mrb[0].mxu1 %vm376_vm0, %v366_v5 }
  0x17   : > { %453 = vmatprep.mubr.f32.mxu0 %v1750_v0  ;;  %530 = vmatprep.mubr.f32.mxu1 %v1750_v0 }
  0x1a   : > { %1543 = vmatmul.mubr.msk.f32.gmra.mrb[2].mxu0 %vm376_vm0, %v367_v6  ;;  %1545 = vmatmul.mubr.msk.f32.gmra.mrb[2].mxu1 %vm376_vm0, %v367_v6 }
  0x1b   : > { %617 = vmatprep.mubr.f32.mxu0 %v1750_v0  ;;  %706 = vmatprep.mubr.f32.mxu1 %v1750_v0 }
  0xe9   : > { %v449_v11 = vpop.f32.mrb[0].mxu0  ;;  %v526_v12 = vpop.f32.mrb[0].mxu1 }
  0xea   : > { %v450_v13 = vadd.f32 %v449_v11, %v368_v7  ;;  %v527_v14 = vadd.f32 %v526_v12, %v370_v8  ;;  %v451_v15 = vpop.f32.mrb[1].mxu0  ;;  %v528_v16 = vpop.f32.mrb[1].mxu1 }
  0xeb   : > { %v452_v17 = vadd.f32 %v451_v15, %v369_v9  ;;  %v529_v18 = vadd.f32 %v528_v16, %v371_v10 }
  0xed   : > { %v455_v23 = vpop.f32.mrb[2].mxu0  ;;  %v532_v24 = vpop.f32.mrb[2].mxu1 }
  0xee   : > { %v456_v25 = vadd.f32 %v455_v23, %v372_v19  ;;  %v533_v26 = vadd.f32 %v532_v24, %v374_v20  ;;  %v457_v27 = vpop.f32.mrb[3].mxu0  ;;  %v534_v28 = vpop.f32.mrb[3].mxu1 }
  0xef   : > { %v458_v29 = vadd.f32 %v457_v27, %v373_v21  ;;  %v535_v30 = vadd.f32 %v534_v28, %v375_v22 }
  0xf0   : > { %v1589_v31 = vpack.c.bf16 %v456_v25, %v450_v13  ;;  %v1593_v32 = vpack.c.bf16 %v533_v26, %v527_v14 }
  0xf1   : > { %v1587_v33 = vpack.c.bf16 %v458_v29, %v452_v17  ;;  %v1591_v34 = vpack.c.bf16 %v535_v30, %v529_v18 }
  0xf3   : > { %1588 = vmatprep.subr.bf16.mxu0 %v1587_v33  ;;  %1592 = vmatprep.subr.bf16.mxu1 %v1591_v34 }
  0xf4   : > { %1590 = vmatpush1.bf16.msra.mxu0 %v1589_v31  ;;  %1594 = vmatpush1.bf16.msra.mxu1 %v1593_v32 }
  0xf5   : > { %1596 = vmatprep.subr.bf16.mxu0 %v1587_v33  ;;  %1600 = vmatprep.subr.bf16.mxu1 %v1591_v34 }
  0xf7   : > { %1546 = vmatmul.mubr.msk.f32.vlgmr.msra.gmra.mrb[4].mxu0 %vm376_vm0, %v537_v35  ;;  %1550 = vmatmul.mubr.msk.f32.vlgmr.msra.gmra.mrb[4].mxu1 %vm376_vm0, %v537_v35 }
  0xf8   : > { %1598 = vmatpush1.bf16.msra.mxu0 %v1589_v31  ;;  %1602 = vmatpush1.bf16.msra.mxu1 %v1593_v32 }
  0xf9   : > { %1604 = vmatprep.subr.bf16.mxu0 %v1587_v33  ;;  %1608 = vmatprep.subr.bf16.mxu1 %v1591_v34 }
  0xfa   : > { %623 = vmatprep.mubr.f32.mxu0 %v1750_v0  ;;  %712 = vmatprep.mubr.f32.mxu1 %v1750_v0 }
  0xfb   : > { %1547 = vmatmul.mubr.msk.f32.gmra.mrb[6].mxu0 %vm376_vm0, %v538_v36  ;;  %1551 = vmatmul.mubr.msk.f32.gmra.mrb[6].mxu1 %vm376_vm0, %v538_v36 }
  0xfc   : > { %629 = vmatprep.mubr.f32.mxu0 %v1750_v0  ;;  %718 = vmatprep.mubr.f32.mxu1 %v1750_v0 }
  0xff   : > { %1548 = vmatmul.mubr.msk.f32.gmra.mrb[8].mxu0 %vm376_vm0, %v539_v37  ;;  %1552 = vmatmul.mubr.msk.f32.gmra.mrb[8].mxu1 %vm376_vm0, %v539_v37 }
 0x100   : > { %635 = vmatprep.mubr.f32.mxu0 %v1750_v0  ;;  %724 = vmatprep.mubr.f32.mxu1 %v1750_v0 }
 0x103   : > { %1549 = vmatmul.mubr.msk.f32.gmra.mrb[10].mxu0 %vm376_vm0, %v540_v38  ;;  %1553 = vmatmul.mubr.msk.f32.gmra.mrb[10].mxu1 %vm376_vm0, %v540_v38 }
 0x104   : > { %949 = vmatprep.mubr.f32.mxu0 %v1750_v0  ;;  %1026 = vmatprep.mubr.f32.mxu1 %v1750_v0 }
 0x107   : > { %1554 = vmatmul.mubr.msk.f32.vlgmr.msra.gmra.mrb[12].mxu0 %vm376_vm0, %v877_v39  ;;  %1556 = vmatmul.mubr.msk.f32.vlgmr.msra.gmra.mrb[12].mxu1 %vm376_vm0, %v877_v39 }
 0x108   : > { %1606 = vmatpush1.bf16.msra.mxu0 %v1589_v31  ;;  %1610 = vmatpush1.bf16.msra.mxu1 %v1593_v32 }
 0x109   : > { %955 = vmatprep.mubr.f32.mxu0 %v1750_v0  ;;  %1032 = vmatprep.mubr.f32.mxu1 %v1750_v0 }
 0x10b   : > { %1555 = vmatmul.mubr.msk.f32.gmra.mrb[14].mxu0 %vm376_vm0, %v878_v40  ;;  %1557 = vmatmul.mubr.msk.f32.gmra.mrb[14].mxu1 %vm376_vm0, %v878_v40 }
 0x10c   : > { %1111 = vmatprep.mubr.f32.mxu0 %v1750_v0  ;;  %1188 = vmatprep.mubr.f32.mxu1 %v1750_v0 }
 0x10f   : > { %1558 = vmatmul.mubr.msk.f32.vlgmr.msra.gmra.mrb[16].mxu0 %vm376_vm0, %v1039_v41  ;;  %1560 = vmatmul.mubr.msk.f32.vlgmr.msra.gmra.mrb[16].mxu1 %vm376_vm0, %v1039_v41 }
 0x110   : > { %1117 = vmatprep.mubr.f32.mxu0 %v1750_v0  ;;  %1194 = vmatprep.mubr.f32.mxu1 %v1750_v0 }
 0x113   : > { %1559 = vmatmul.mubr.msk.f32.gmra.mrb[18].mxu0 %vm376_vm0, %v1040_v42  ;;  %1561 = vmatmul.mubr.msk.f32.gmra.mrb[18].mxu1 %vm376_vm0, %v1040_v42 }
 0x114   : > { %1328 = vmatprep.mubr.f32.mxu0 %v1750_v0  ;;  %1405 = vmatprep.mubr.f32.mxu1 %v1750_v0 }
 0x1ca   : > { %v619_v43 = vpop.f32.mrb[4].mxu0  ;;  %v708_v44 = vpop.f32.mrb[4].mxu1 }
 0x1cb   : > { %v747_v45 = vmul.f32 0.044715, %v619_v43  ;;  %v749_v46 = vmul.f32 0.044715, %v708_v44  ;;  %v621_v47 = vpop.f32.mrb[5].mxu0  ;;  %v710_v48 = vpop.f32.mrb[5].mxu1 }
 0x1cc   : > { %v748_v51 = vmul.f32 0.044715, %v621_v47  ;;  %v750_v52 = vmul.f32 0.044715, %v710_v48  ;;  %v1899_v61 = vmul.f32 0.5, %v619_v43  ;;  %v1901_v62 = vmul.f32 0.5, %v708_v44 }
 0x1cd   : > { %v763_v49 = vmul.f32 %v747_v45, %v619_v43  ;;  %v765_v50 = vmul.f32 %v749_v46, %v708_v44  ;;  %v1918_v24 = vmul.f32 0.5, %v621_v47  ;;  %v1932_v34 = vmul.f32 0.5, %v710_v48 }
 0x1ce   : > { %v625_v53 = vpop.f32.mrb[6].mxu0  ;;  %v1893_v54 = vpop.f32.mrb[6].mxu1  ;;  %v764_v57 = vmul.f32 %v748_v51, %v621_v47  ;;  %v766_v58 = vmul.f32 %v750_v52, %v710_v48 }
 0x1cf   : > { %v779_v55 = vmul.f32 %v763_v49, %v619_v43  ;;  %v781_v56 = vmul.f32 %v765_v50, %v708_v44  ;;  %v1895_v59 = vpop.f32.mrb[7].mxu0  ;;  %v1897_v60 = vpop.f32.mrb[7].mxu1  ;;  %v751_v63 = vmul.f32 0.044715, %v625_v53  ;;  %v753_v1 = vmul.f32 0.044715, %v1893_v54 }
 0x1d0   : > { %v780_v4 = vmul.f32 %v764_v57, %v621_v47  ;;  %v782_v5 = vmul.f32 %v766_v58, %v710_v48  ;;  %v752_v8 = vmul.f32 0.044715, %v1895_v59  ;;  %v754_v9 = vmul.f32 0.044715, %v1897_v60 }
 0x1d1   : > { %v795_v2 = vadd.f32 %v779_v55, %v619_v43  ;;  %v797_v3 = vadd.f32 %v781_v56, %v708_v44  ;;  %v767_v6 = vmul.f32 %v751_v63, %v625_v53  ;;  %v769_v7 = vmul.f32 %v753_v1, %v1893_v54 }
 0x1d2   : > { %v1907_v10 = vpop.f32.mrb[8].mxu0  ;;  %v1909_v11 = vpop.f32.mrb[8].mxu1  ;;  %v796_v14 = vadd.f32 %v780_v4, %v621_v47  ;;  %v798_v15 = vadd.f32 %v782_v5, %v710_v48  ;;  %v768_v20 = vmul.f32 %v752_v8, %v1895_v59  ;;  %v770_v21 = vmul.f32 %v754_v9, %v1897_v60 }
 0x1d3   : > { %v811_v12 = vmul.f32 0.7978846, %v795_v2  ;;  %v813_v13 = vmul.f32 0.7978846, %v797_v3  ;;  %v1911_v16 = vpop.f32.mrb[9].mxu0  ;;  %v1913_v17 = vpop.f32.mrb[9].mxu1  ;;  %v783_v18 = vmul.f32 %v767_v6, %v625_v53  ;;  %v785_v19 = vmul.f32 %v769_v7, %v1893_v54 }
 0x1d4   : > { %v812_v22 = vmul.f32 0.7978846, %v796_v14  ;;  %v814_v23 = vmul.f32 0.7978846, %v798_v15  ;;  %v784_v27 = vmul.f32 %v768_v20, %v1895_v59  ;;  %v786_v30 = vmul.f32 %v770_v21, %v1897_v60 }
 0x1d5   : > { %1662 = vtanh.f32 %v811_v12  ;;  %v799_v25 = vadd.f32 %v783_v18, %v625_v53  ;;  %v801_v26 = vadd.f32 %v785_v19, %v1893_v54  ;;  %v755_v31 = vmul.f32 0.044715, %v1907_v10 }
 0x1d6   : > { %1664 = vtanh.f32 %v813_v13  ;;  %v1922_v28 = vpop.f32.mrb[10].mxu0  ;;  %v1924_v29 = vpop.f32.mrb[10].mxu1  ;;  %v800_v37 = vadd.f32 %v784_v27, %v1895_v59  ;;  %v802_v38 = vadd.f32 %v786_v30, %v1897_v60  ;;  %v757_v40 = vmul.f32 0.044715, %v1909_v11 }
 0x1d7   : > { %1666 = vtanh.f32 %v812_v22  ;;  %v1928_v32 = vpop.f32.mrb[11].mxu0  ;;  %v1930_v33 = vpop.f32.mrb[11].mxu1  ;;  %v815_v35 = vmul.f32 0.7978846, %v799_v25  ;;  %v817_v36 = vmul.f32 0.7978846, %v801_v26  ;;  %v771_v39 = vmul.f32 %v755_v31, %v1907_v10 }
 0x1d8   : > { %1668 = vtanh.f32 %v814_v23  ;;  %v756_v41 = vmul.f32 0.044715, %v1911_v16  ;;  %v1939_v42 = vmul.f32 0.5, %v625_v53  ;;  %v816_v43 = vmul.f32 0.7978846, %v800_v37 }
 0x1d9   : > { %1670 = vtanh.f32 %v815_v35  ;;  %v758_v44 = vmul.f32 0.044715, %v1913_v17  ;;  %v818_v46 = vmul.f32 0.7978846, %v802_v38  ;;  %v787_v47 = vmul.f32 %v771_v39, %v1907_v10 }
 0x1da   : > { %v1942_v45 = vpop.f32.mrb[12].mxu0  ;;  %1672 = vtanh.f32 %v817_v36  ;;  %v773_v48 = vmul.f32 %v757_v40, %v1909_v11  ;;  %v1946_v49 = vpop.f32.mrb[12].mxu1  ;;  %v772_v51 = vmul.f32 %v756_v41, %v1911_v16  ;;  %v759_v53 = vmul.f32 0.044715, %v1922_v28 }
 0x1db   : > { %v1948_v50 = vpop.f32.mrb[13].mxu0  ;;  %1674 = vtanh.f32 %v816_v43  ;;  %v774_v52 = vmul.f32 %v758_v44, %v1913_v17  ;;  %v1953_v55 = vpop.f32.mrb[13].mxu1  ;;  %v1956_v56 = vmul.f32 0.5, %v1893_v54  ;;  %v803_v57 = vadd.f32 %v787_v47, %v1907_v10 }
 0x1dc   : > { %1676 = vtanh.f32 %v818_v46  ;;  %v789_v58 = vmul.f32 %v773_v48, %v1909_v11  ;;  %v788_v63 = vmul.f32 %v772_v51, %v1911_v16  ;;  %v775_v2 = vmul.f32 %v759_v53, %v1922_v28 }
 0x1dd   : > { %v790_v1 = vmul.f32 %v774_v52, %v1913_v17  ;;  %v761_v3 = vmul.f32 0.044715, %v1924_v29  ;;  %v819_v54 = vmul.f32 0.7978846, %v803_v57  ;;  %v760_v8 = vmul.f32 0.044715, %v1928_v32 }
 0x1de   : > { %v1964_v4 = vpop.f32.mrb[14].mxu0  ;;  %v1966_v5 = vpop.f32.mrb[14].mxu1  ;;  %v805_v7 = vadd.f32 %v789_v58, %v1909_v11  ;;  %v762_v9 = vmul.f32 0.044715, %v1930_v33  ;;  %v804_v13 = vadd.f32 %v788_v63, %v1911_v16  ;;  %v791_v15 = vmul.f32 %v775_v2, %v1922_v28 }
 0x1df   : > { %v1663_v6 = vpop.eup %1662  ;;  %v806_v14 = vadd.f32 %v790_v1, %v1913_v17  ;;  %v777_v18 = vmul.f32 %v761_v3, %v1924_v29  ;;  %v1975_v19 = vpop.f32.mrb[15].mxu0  ;;  %1678 = vtanh.f32 %v819_v54  ;;  %v776_v23 = vmul.f32 %v760_v8, %v1928_v32 }
 0x1e0   : > { %v1665_v12 = vpop.eup %1664  ;;  %v1977_v20 = vpop.f32.mrb[15].mxu1  ;;  %v821_v22 = vmul.f32 0.7978846, %v805_v7  ;;  %v778_v25 = vmul.f32 %v762_v9, %v1930_v33  ;;  %v820_v27 = vmul.f32 0.7978846, %v804_v13  ;;  %v807_v31 = vadd.f32 %v791_v15, %v1922_v28 }
 0x1e1   : > { %v1667_v21 = vpop.eup %1666  ;;  %v822_v30 = vmul.f32 0.7978846, %v806_v14  ;;  %v793_v35 = vmul.f32 %v777_v18, %v1924_v29  ;;  %v792_v38 = vmul.f32 %v776_v23, %v1928_v32  ;;  %v736_v40 = vmul.f32 0.5, %v1895_v59 }
 0x1e2   : > { %v1669_v26 = vpop.eup %1668  ;;  %v1113_v36 = vpop.f32.mrb[16].mxu0  ;;  %1680 = vtanh.f32 %v821_v22  ;;  %v794_v39 = vmul.f32 %v778_v25, %v1930_v33  ;;  %v823_v46 = vmul.f32 0.7978846, %v807_v31  ;;  %v844_v48 = vadd.f32 1.0, %v1667_v21 }
 0x1e3   : > { %v1983_v37 = vpop.f32.mrb[16].mxu1  ;;  %v1988_v41 = vpop.f32.mrb[17].mxu0  ;;  %1682 = vtanh.f32 %v820_v27  ;;  %v809_v47 = vadd.f32 %v793_v35, %v1924_v29  ;;  %v808_v52 = vadd.f32 %v792_v38, %v1928_v32  ;;  %v738_v57 = vmul.f32 0.5, %v1897_v60 }
 0x1e4   : > { %v1990_v43 = vpop.f32.mrb[17].mxu1  ;;  %v1671_v44 = vpop.eup %1670  ;;  %1684 = vtanh.f32 %v822_v30  ;;  %v810_v53 = vadd.f32 %v794_v39, %v1930_v33  ;;  %v860_v63 = vmul.f32 %v844_v48, %v1918_v24  ;;  %v846_v1 = vadd.f32 1.0, %v1669_v26 }
 0x1e5   : > { %v1673_v51 = vpop.eup %1672  ;;  %1686 = vtanh.f32 %v823_v46  ;;  %v825_v59 = vmul.f32 0.7978846, %v809_v47  ;;  %v824_v7 = vmul.f32 0.7978846, %v808_v52  ;;  %v843_v13 = vadd.f32 1.0, %v1663_v6 }
 0x1e6   : > { %v1675_v58 = vpop.eup %1674  ;;  %v1997_v2 = vpop.f32.mrb[18].mxu0  ;;  %v826_v8 = vmul.f32 0.7978846, %v810_v53  ;;  %v862_v15 = vmul.f32 %v846_v1, %v1932_v34  ;;  %v847_v60 = vadd.f32 1.0, %v1671_v44  ;;  %v845_v23 = vadd.f32 1.0, %v1665_v12 }
 0x1e7   : > { %v1999_v3 = vpop.f32.mrb[18].mxu1  ;;  %v1677_v54 = vpop.eup %1676  ;;  %v848_v9 = vadd.f32 1.0, %v1675_v58  ;;  %1688 = vtanh.f32 %v825_v59  ;;  %v859_v22 = vmul.f32 %v843_v13, %v1899_v61  ;;  %v849_v27 = vadd.f32 1.0, %v1673_v51 }
 0x1e8   : > { %v850_v14 = vadd.f32 1.0, %v1677_v54  ;;  %v2002_v18 = vpop.f32.mrb[19].mxu0  ;;  %v2004_v21 = vpop.f32.mrb[19].mxu1  ;;  %1690 = vtanh.f32 %v824_v7  ;;  %v863_v26 = vmul.f32 %v847_v60, %v1939_v42  ;;  %v861_v34 = vmul.f32 %v845_v23, %v1901_v62 }
 0x1e9   : > { %v864_v24 = vmul.f32 %v848_v9, %v736_v40  ;;  %1692 = vtanh.f32 %v826_v8  ;;  %v1679_v6 = vpop.eup %1678  ;;  %v865_v38 = vmul.f32 %v849_v27, %v1956_v56  ;;  %v1562_v44 = vmul.f32 -1.442695, %v1113_v36 }
 0x1ea   : > { %v866_v25 = vmul.f32 %v850_v14, %v738_v57  ;;  %v1613_v35 = vpack.c.bf16 %v863_v26, %v859_v22  ;;  %v851_v46 = vadd.f32 1.0, %v1679_v6  ;;  %v739_v47 = vmul.f32 0.5, %v1907_v10 }
 0x1eb   : > { %v1611_v30 = vpack.c.bf16 %v864_v24, %v860_v63  ;;  %v1621_v61 = vpack.c.bf16 %v865_v38, %v861_v34  ;;  %1694 = vpow2.f32 %v1562_v44  ;;  %v743_v48 = vmul.f32 0.5, %v1922_v28 }
 0x1ec   : > { %v1619_v31 = vpack.c.bf16 %v866_v25, %v862_v15  ;;  %v1681_v39 = vpop.eup %1680  ;;  %v741_v56 = vmul.f32 0.5, %v1909_v11  ;;  %v745_v36 = vmul.f32 0.5, %v1924_v29  ;;  %v740_v53 = vmul.f32 0.5, %v1911_v16 }
 0x1ed   : > { %1612 = vmatprep.subr.bf16.mxu0 %v1611_v30  ;;  %v1683_v40 = vpop.eup %1682  ;;  %v853_v62 = vadd.f32 1.0, %v1681_v39  ;;  %v867_v63 = vmul.f32 %v851_v46, %v739_v47  ;;  %v744_v10 = vmul.f32 0.5, %v1928_v32  ;;  %v742_v28 = vmul.f32 0.5, %v1913_v17  ;;  %v875_v17 = vld [vmem:[%s2059_s4] sm:$0xff]  ;;  %v876_v32 = vld [vmem:[%s2059_s4 + $0x8] sm:$0xff] }
 0x1ee   : > { %1620 = vmatprep.subr.bf16.mxu1 %v1619_v31  ;;  %1614 = vmatpush1.bf16.msra.mxu0 %v1613_v35  ;;  %v1685_v12 = vpop.eup %1684  ;;  %v852_v57 = vadd.f32 1.0, %v1683_v40  ;;  %v746_v9 = vmul.f32 0.5, %v1930_v33  ;;  %v1564_v30 = vmul.f32 -1.442695, %v1983_v37  ;;  %v1563_v31 = vmul.f32 -1.442695, %v1988_v41 }
 0x1ef   : > { %v1687_v42 = vpop.eup %1686  ;;  %1622 = vmatpush1.bf16.msra.mxu1 %v1621_v61  ;;  %v854_v59 = vadd.f32 1.0, %v1685_v12  ;;  %v869_v14 = vmul.f32 %v853_v62, %v741_v56  ;;  %v1565_v35 = vmul.f32 -1.442695, %v1990_v43  ;;  %v1566_v34 = vmul.f32 -1.442695, %v1997_v2 }
 0x1f0   : > { %v855_v51 = vadd.f32 1.0, %v1687_v42  ;;  %v868_v15 = vmul.f32 %v852_v57, %v740_v53  ;;  %v1568_v38 = vmul.f32 -1.442695, %v1999_v3  ;;  %v1567_v39 = vmul.f32 -1.442695, %v2002_v18 }
 0x1f1   : > { %v1689_v52 = vpop.eup %1688  ;;  %v870_v60 = vmul.f32 %v854_v59, %v742_v28 }
 0x1f2   : > { %v1691_v58 = vpop.eup %1690  ;;  %v871_v1 = vmul.f32 %v855_v51, %v743_v48  ;;  %v857_v54 = vadd.f32 1.0, %v1689_v52 }
 0x1f3   : > { %v1693_v7 = vpop.eup %1692  ;;  %v856_v8 = vadd.f32 1.0, %v1691_v58 }
 0x1f4   : > { %v858_v13 = vadd.f32 1.0, %v1693_v7  ;;  %v1617_v11 = vpack.c.bf16 %v871_v1, %v867_v63  ;;  %v873_v29 = vmul.f32 %v857_v54, %v745_v36 }
 0x1f5   : > { %v872_v16 = vmul.f32 %v856_v8, %v744_v10  ;;  %v1695_v25 = vpop.eup %1694 }
 0x1f6   : > { %v874_v24 = vmul.f32 %v858_v13, %v746_v9  ;;  %v1625_v22 = vpack.c.bf16 %v873_v29, %v869_v14  ;;  %v1225_v27 = vadd.f32 1.0, %v1695_v25 }
 0x1f7   : > { %v1615_v23 = vpack.c.bf16 %v872_v16, %v868_v15 }
 0x1f8   : > { %v1623_v26 = vpack.c.bf16 %v874_v24, %v870_v60  ;;  %1696 = vrcp.f32 %v1225_v27 }
 0x1f9   : > { %1616 = vmatprep.subr.bf16.mxu0 %v1615_v23  ;;  %1698 = vpow2.f32 %v1564_v30 }
 0x1fa   : > { %1624 = vmatprep.subr.bf16.mxu1 %v1623_v26  ;;  %1618 = vmatpush1.bf16.msra.mxu0 %v1617_v11  ;;  %1700 = vpow2.f32 %v1563_v31 }
 0x1fb   : > { %1626 = vmatpush1.bf16.msra.mxu1 %v1625_v22  ;;  %1702 = vpow2.f32 %v1565_v35 }
 0x1fc   : > { %1704 = vpow2.f32 %v1566_v34 }
 0x1fd   : > { %1570 = vmatmul.mubr.msk.f32.vlgmr.msra.gmra.mrb[20].mxu0 %vm1257_vm1, %v875_v17  ;;  %1706 = vpow2.f32 %v1568_v38 }
 0x1fe   : > { %1572 = vmatmul.mubr.msk.f32.vlgmr.msra.gmra.mrb[20].mxu1 %vm1257_vm1, %v875_v17  ;;  %1334 = vmatprep.mubr.f32.mxu0 %v1750_v0  ;;  %1708 = vpow2.f32 %v1567_v39 }
 0x1ff   : > { %1411 = vmatprep.mubr.f32.mxu1 %v1750_v0  ;;  %v1569_v0 = vmul.f32 -1.442695, %v2004_v21 }
 0x201   : > { %1571 = vmatmul.mubr.msk.f32.gmra.mrb[22].mxu0 %vm1257_vm1, %v876_v32  ;;  %1710 = vpow2.f32 %v1569_v0 }
 0x202   : > { %1573 = vmatmul.mubr.msk.f32.gmra.mrb[22].mxu1 %vm1257_vm1, %v876_v32  ;;  %v1697_v33 = vpop.eup %1696 }
 0x203   : > { %v1249_v6 = vmul.f32 %v1697_v33, %v1942_v45  ;;  %v1699_v45 = vpop.eup %1698 }
 0x204   : > { %v1701_v37 = vpop.eup %1700  ;;  %v1227_v43 = vadd.f32 1.0, %v1699_v45 }
 0x205   : > { %v1703_v41 = vpop.eup %1702  ;;  %v1226_v2 = vadd.f32 1.0, %v1701_v37 }
 0x206   : > { %v1705_v44 = vpop.eup %1704  ;;  %v1228_v12 = vadd.f32 1.0, %v1703_v41  ;;  %1712 = vrcp.f32 %v1227_v43 }
 0x207   : > { %v1707_v40 = vpop.eup %1706  ;;  %v1229_v46 = vadd.f32 1.0, %v1705_v44  ;;  %1714 = vrcp.f32 %v1226_v2 }
 0x208   : > { %v1709_v61 = vpop.eup %1708  ;;  %v1231_v18 = vadd.f32 1.0, %v1707_v40  ;;  %1716 = vrcp.f32 %v1228_v12 }
 0x209   : > { %v1230_v42 = vadd.f32 1.0, %v1709_v61  ;;  %1718 = vrcp.f32 %v1229_v46 }
 0x20a   : > { %1720 = vrcp.f32 %v1231_v18 }
 0x20b   : > { %v1711_v3 = vpop.eup %1710  ;;  %1722 = vrcp.f32 %v1230_v42 }
 0x20c   : > { %v1232_v21 = vadd.f32 1.0, %v1711_v3 }
 0x20e   : > { %1724 = vrcp.f32 %v1232_v21 }
 0x210   : > { %v1713_v47 = vpop.eup %1712 }
 0x211   : > { %v1715_v48 = vpop.eup %1714  ;;  %v1251_v36 = vmul.f32 %v1713_v47, %v1946_v49 }
 0x212   : > { %v1717_v51 = vpop.eup %1716  ;;  %v1250_v53 = vmul.f32 %v1715_v48, %v1948_v50 }
 0x213   : > { %v1719_v62 = vpop.eup %1718  ;;  %v1252_v57 = vmul.f32 %v1717_v51, %v1953_v55 }
 0x214   : > { %v1721_v52 = vpop.eup %1720  ;;  %v1253_v59 = vmul.f32 %v1719_v62, %v1964_v4 }
 0x215   : > { %v1723_v56 = vpop.eup %1722  ;;  %v1255_v63 = vmul.f32 %v1721_v52, %v1966_v5 }
 0x216   : > { %v1254_v1 = vmul.f32 %v1723_v56, %v1975_v19 }
 0x218   : > { %v1725_v58 = vpop.eup %1724 }
 0x219   : > { %v1256_v54 = vmul.f32 %v1725_v58, %v1977_v20 }
 0x2d0   : > { %v1330_v7 = vpop.f32.mrb[20].mxu0 }
 0x2d1   : > { %v1331_v49 = vadd.f32 %v1330_v7, %v1249_v6  ;;  %v1407_v10 = vpop.f32.mrb[20].mxu1  ;;  %v1332_v50 = vpop.f32.mrb[21].mxu0 }
 0x2d2   : > { %v1408_v8 = vadd.f32 %v1407_v10, %v1251_v36  ;;  %v1333_v55 = vadd.f32 %v1332_v50, %v1250_v53  ;;  %v1409_v28 = vpop.f32.mrb[21].mxu1 }
 0x2d3   : > { %1418 = vst [vmem:[%s352_s21] sm:$0xff] %v1331_v49  ;;  %v1410_v4 = vadd.f32 %v1409_v28, %v1252_v57 }
 0x2d4   : > { %1420 = vst [vmem:[%s352_s21 + $0x10] sm:$0xff] %v1408_v8  ;;  %1419 = vst [vmem:[%s352_s21 + $0x8] sm:$0xff] %v1333_v55  ;;  %v1336_v5 = vpop.f32.mrb[22].mxu0 }
 0x2d5   : > { %1421 = vst [vmem:[%s352_s21 + $0x18] sm:$0xff] %v1410_v4  ;;  %v1337_v19 = vadd.f32 %v1336_v5, %v1253_v59  ;;  %v1413_v20 = vpop.f32.mrb[22].mxu1  ;;  %v1338_v9 = vpop.f32.mrb[23].mxu0 }
 0x2d6   : > { %v1414_v13 = vadd.f32 %v1413_v20, %v1255_v63  ;;  %v1339_v11 = vadd.f32 %v1338_v9, %v1254_v1  ;;  %v1415_v14 = vpop.f32.mrb[23].mxu1 }
 0x2d7   : > { %1422 = vst [vmem:[%s352_s21 + $0x20] sm:$0xff] %v1337_v19  ;;  %v1416_v29 = vadd.f32 %v1415_v14, %v1256_v54 }
 0x2d8   : > { %1424 = vst [vmem:[%s352_s21 + $0x30] sm:$0xff] %v1414_v13  ;;  %1423 = vst [vmem:[%s352_s21 + $0x28] sm:$0xff] %v1339_v11 }
 0x2d9   : > { %1425 = vst [vmem:[%s352_s21 + $0x38] sm:$0xff] %v1416_v29 }
 0x2da PF: > { %s17_s26 = sadd.s32 1, %s1748_s26   ;;  %s2063_s24 = smov %s1744_s25 }
 0x2db   : > { %p14_p5 = scmp.ge.s32.totalorder %s17_s26, 4   ;;  %s2064_s25 = smov %s2066_s27 }
 0x2dd   :  { %16 = sbr.rel (!%p14_p5) target bundleno = 2 (0x2), region = 81 }

</bundles_post_ra>
